<compile_context>
chip_gen: v6e
topology: v6e:2x2x1
jax: 0.10.0
libtpu: 0.0.40
codegen_flags: <defaults>
</compile_context>

<pallas_src>
import functools

import jax
import jax.numpy as jnp
from jax.experimental import pallas as pl
from jax.experimental.pallas import tpu as pltpu


def _blstm_kernel(gates_ref, whh_ref, out_ref, h_ref, c_ref, *, hidden_size, chunk):
    """One (direction, time-chunk) grid step: K LSTM steps of one direction."""
    H, K = hidden_size, chunk

    @pl.when(pl.program_id(1) == 0)        # first chunk of this direction
    def _init():
        h_ref[...] = jnp.zeros_like(h_ref)
        c_ref[...] = jnp.zeros_like(c_ref)

    whh = whh_ref[...]                     # (H, 4H) compute dtype; hoisted
    h = h_ref[...]                         # (B, H) f32 carried state
    c = c_ref[...]

    # Static (fully unrolled) loop over the K timesteps of this chunk; h/c live
    # in vregs across the unrolled steps and hit scratch only once per chunk.
    for k in range(K):
        pre = gates_ref[:, k, :].astype(jnp.float32)             # (B, 4H)
        gates = pre + jnp.dot(h.astype(whh.dtype), whh,
                              preferred_element_type=jnp.float32)
        sig = jax.nn.sigmoid(gates)        # full-width nonlinearities (f32)
        tnh = jnp.tanh(gates)
        i = sig[:, 0 * H:1 * H]
        f = sig[:, 1 * H:2 * H]
        g = tnh[:, 2 * H:3 * H]
        o = sig[:, 3 * H:4 * H]
        c = f * c + i * g
        h = o * jnp.tanh(c)
        out_ref[:, k, :] = h.astype(out_ref.dtype)

    h_ref[...] = h
    c_ref[...] = c


def _pick_chunk(T, requested):
    """Largest valid timestep chunk: multiple of 8 dividing T (or T itself)."""
    if requested is not None and T % requested == 0 and (requested % 8 == 0 or requested == T):
        return requested
    for k in range(min(T, 64), 0, -1):
        if T % k == 0 and k % 8 == 0:
            return k
    return T


def _vmem_limit_bytes(B, K, H, compute_dtype, out_dtype):
    ci = jnp.dtype(compute_dtype).itemsize
    oi = jnp.dtype(out_dtype).itemsize
    ws = (2 * B * K * 4 * H * ci      # gates block, double-buffered
          + 2 * H * 4 * H * ci        # whh block, double-buffered
          + 2 * B * K * H * oi        # out block, double-buffered
          + 2 * B * H * 4)            # h/c f32 scratch
    return int(min(64 * 2 ** 20, max(32 * 2 ** 20, 2 * ws)))


def reblstm_forward(x, params, *, chunk=8, compute_dtype=jnp.bfloat16):
    """x: (B, T, D) batch_first, like the PyTorch module.  Returns (B, T, H).

    params:
      wih: (2, D, 4H)  stacked [fwd, bwd] input-projection weights (transposed)
      whh: (2, H, 4H)  stacked recurrent weights (transposed)
      b:   (2, 4H)     stacked pre-summed biases (b_ih + b_hh)
    """
    B, T, D = x.shape
    H = params["whh"].shape[1]
    K = _pick_chunk(T, chunk)
    Tk = T // K

    # ---- hoisted input projection: one big parallel matmul (bias folded in) ----
    x_c = x.astype(compute_dtype)
    wih = params["wih"].astype(compute_dtype)
    whh = params["whh"].astype(compute_dtype)
    bias = params["b"].astype(jnp.float32)

    gates = jnp.einsum("btd,zdg->zbtg", x_c, wih,
                       preferred_element_type=jnp.float32) + bias[:, None, None, :]
    # Pre-reverse the backward direction in time so the kernel runs both
    # directions "forward" with static indices; the wrapper un-reverses at the end.
    gates = jnp.stack([gates[0], gates[1][:, ::-1, :]], axis=0).astype(compute_dtype)

    out = pl.pallas_call(
        functools.partial(_blstm_kernel, hidden_size=H, chunk=K),
        out_shape=jax.ShapeDtypeStruct((2, B, T, H), x.dtype),
        grid_spec=pltpu.PrefetchScalarGridSpec(
            num_scalar_prefetch=0,
            grid=(2, Tk),                                   # (direction, time-chunk)
            in_specs=[
                # pre-activations: (B, K, 4H) block per (direction, chunk)
                pl.BlockSpec((None, B, K, 4 * H), lambda d, t: (d, 0, t, 0)),
                # recurrent weights: one (H, 4H) block per direction (constant in t)
                pl.BlockSpec((None, H, 4 * H), lambda d, t: (d, 0, 0)),
            ],
            out_specs=pl.BlockSpec((None, B, K, H), lambda d, t: (d, 0, t, 0)),
            scratch_shapes=[pltpu.VMEM((B, H), jnp.float32),   # h state
                            pltpu.VMEM((B, H), jnp.float32)],  # c state
        ),
        compiler_params=pltpu.CompilerParams(
            # direction axis is embarrassingly parallel (v7x: one TC per direction);
            # the time-chunk axis carries the recurrence -> arbitrary/sequential.
            dimension_semantics=("parallel", "arbitrary"),
            vmem_limit_bytes=_vmem_limit_bytes(B, K, H, compute_dtype, x.dtype)),
    )(gates, whh)

    # reBlstm.forward: fwd half + bwd half (bwd output comes back time-reversed).
    return out[0] + out[1][:, ::-1, :]


# ------------------------- pure-JAX reference -------------------------
def _lstm_ref_dir(x_tm, wihT, whhT, b, H):
    def step(carry, x_t):
        h, c = carry
        gates = x_t @ wihT + h @ whhT + b
        i = jax.nn.sigmoid(gates[:, :H])
        f = jax.nn.sigmoid(gates[:, H:2 * H])
        g = jnp.tanh(gates[:, 2 * H:3 * H])
        o = jax.nn.sigmoid(gates[:, 3 * H:])
        c = f * c + i * g
        h = o * jnp.tanh(c)
        return (h, c), h

    Bn = x_tm.shape[1]
    init = (jnp.zeros((Bn, H), jnp.float32), jnp.zeros((Bn, H), jnp.float32))
    _, hs = jax.lax.scan(step, init, x_tm)
    return hs


if __name__ == "__main__":
    B, T, D, H = 2, 32, 16, 32   # batch, seq, input_size, hidden_size
    key = jax.random.PRNGKey(0)
    keys = jax.random.split(key, 9)
    stdv = 1.0 / float(H) ** 0.5

    def u(k, shape):   # PyTorch LSTM init: U(-1/sqrt(H), 1/sqrt(H))
        return jax.random.uniform(k, shape, jnp.float32, -stdv, stdv)

    # forward-direction params (PyTorch shapes), then backward-direction params
    wih_f = u(keys[0], (4 * H, D)); whh_f = u(keys[1], (4 * H, H))
    bih_f = u(keys[2], (4 * H,));   bhh_f = u(keys[3], (4 * H,))
    wih_b = u(keys[4], (4 * H, D)); whh_b = u(keys[5], (4 * H, H))
    bih_b = u(keys[6], (4 * H,));   bhh_b = u(keys[7], (4 * H,))
    x = jax.random.normal(keys[8], (B, T, D), jnp.float32)

    params = dict(
        wih=jnp.stack([wih_f.T, wih_b.T]),                 # (2, D, 4H)
        whh=jnp.stack([whh_f.T, whh_b.T]),                 # (2, H, 4H)
        b=jnp.stack([bih_f + bhh_f, bih_b + bhh_b]),       # (2, 4H)
    )

    fwd = jax.jit(functools.partial(reblstm_forward, chunk=8,
                                    compute_dtype=jnp.bfloat16))
    out = jax.block_until_ready(fwd(x, params))
    assert out.shape == (B, T, H)

    # correctness check against a f32 lax.scan reference
    x_tm = jnp.transpose(x, (1, 0, 2))
    hs_f = _lstm_ref_dir(x_tm, params["wih"][0], params["whh"][0],
                         params["b"][0][None, :], H)
    hs_b = _lstm_ref_dir(x_tm[::-1], params["wih"][1], params["whh"][1],
                         params["b"][1][None, :], H)[::-1]
    ref = jnp.transpose(hs_f + hs_b, (1, 0, 2))
    err = float(jnp.max(jnp.abs(out.astype(jnp.float32) - ref)))
    assert err < 5e-2, f"mismatch vs reference: max abs err {err}"

    print("KERNEL_OK")
</pallas_src>

<mosaic_0001>
module attributes {stable_mosaic.version = 11 : i64} {
  func.func @_blstm_kernel(%arg0: i32, %arg1: i32, %arg2: memref<1x2x8x128xbf16, #tpu.memory_space<vmem>>, %arg3: memref<1x32x128xbf16, #tpu.memory_space<vmem>>, %arg4: memref<1x2x8x32xf32, #tpu.memory_space<vmem>>, %arg5: memref<2x32xf32, #tpu.memory_space<vmem>>, %arg6: memref<2x32xf32, #tpu.memory_space<vmem>>) attributes {dimension_semantics = [#tpu.dimension_semantics<parallel>, #tpu.dimension_semantics<arbitrary>], iteration_bounds = array<i64: 2, 4>, scalar_prefetch = 0 : i64, scratch_operands = 2 : i64, tpu.core_type = #tpu.core_type<tc>, window_params = [{transform_indices = @transform_0, window_bounds = array<i64: 1, 2, 8, 128>}, {transform_indices = @transform_1, window_bounds = array<i64: 1, 32, 128>}, {transform_indices = @transform_2, window_bounds = array<i64: 1, 2, 8, 32>}]} {
    %c0_i32 = arith.constant 0 : i32
    %0 = arith.cmpi eq, %arg1, %c0_i32 : i32
    %1 = arith.extui %0 : i1 to i32
    %c0_i32_0 = arith.constant 0 : i32
    %2 = arith.cmpi ne, %1, %c0_i32_0 : i32
    scf.if %2 {
      %cst_83 = arith.constant 0.000000e+00 : f32
      %201 = vector.broadcast %cst_83 : f32 to vector<2x32xf32>
      %c0_84 = arith.constant 0 : index
      %c0_85 = arith.constant 0 : index
      %202 = vector.load %arg5[%c0_84, %c0_85] : memref<2x32xf32, #tpu.memory_space<vmem>>, vector<2x32xf32>
      tpu.vector_store %arg5[%c0_84, %c0_85], %201 {strides = array<i32>} : memref<2x32xf32, #tpu.memory_space<vmem>>, vector<2x32xf32>,
      %cst_86 = arith.constant 0.000000e+00 : f32
      %203 = vector.broadcast %cst_86 : f32 to vector<2x32xf32>
      %c0_87 = arith.constant 0 : index
      %c0_88 = arith.constant 0 : index
      %204 = vector.load %arg6[%c0_87, %c0_88] : memref<2x32xf32, #tpu.memory_space<vmem>>, vector<2x32xf32>
      tpu.vector_store %arg6[%c0_87, %c0_88], %203 {strides = array<i32>} : memref<2x32xf32, #tpu.memory_space<vmem>>, vector<2x32xf32>,
    } else {
    }
    %c0 = arith.constant 0 : index
    %c0_1 = arith.constant 0 : index
    %c0_2 = arith.constant 0 : index
    %3 = vector.load %arg3[%c0, %c0_1, %c0_2] : memref<1x32x128xbf16, #tpu.memory_space<vmem>>, vector<1x32x128xbf16>
    %4 = vector.shape_cast %3 : vector<1x32x128xbf16> to vector<32x128xbf16>
    %c0_3 = arith.constant 0 : index
    %c0_4 = arith.constant 0 : index
    %5 = vector.load %arg5[%c0_3, %c0_4] : memref<2x32xf32, #tpu.memory_space<vmem>>, vector<2x32xf32>
    %c0_5 = arith.constant 0 : index
    %c0_6 = arith.constant 0 : index
    %6 = vector.load %arg6[%c0_5, %c0_6] : memref<2x32xf32, #tpu.memory_space<vmem>>, vector<2x32xf32>
    %c0_7 = arith.constant 0 : index
    %c0_8 = arith.constant 0 : index
    %c0_9 = arith.constant 0 : index
    %c0_10 = arith.constant 0 : index
    %7 = vector.load %arg2[%c0_7, %c0_8, %c0_9, %c0_10] : memref<1x2x8x128xbf16, #tpu.memory_space<vmem>>, vector<1x2x1x128xbf16>
    %8 = vector.shape_cast %7 : vector<1x2x1x128xbf16> to vector<2x128xbf16>
    %9 = arith.extf %8 : vector<2x128xbf16> to vector<2x128xf32>
    %10 = arith.truncf %5 : vector<2x32xf32> to vector<2x32xbf16>
    %cst = arith.constant dense<0.000000e+00> : vector<2x128xf32>
    %11 = tpu.matmul %10, %4, %cst {dimension_numbers = #tpu.dot_dimension_numbers<[1], [0], [0], [1], [0, 0, 1, 1], [], []>} : vector<2x32xbf16>, vector<32x128xbf16>, vector<2x128xf32> -> vector<2x128xf32>
    %12 = arith.addf %9, %11 : vector<2x128xf32>
    %13 = arith.negf %12 : vector<2x128xf32>
    %14 = math.exp %13 : vector<2x128xf32>
    %cst_11 = arith.constant 1.000000e+00 : f32
    %15 = vector.broadcast %cst_11 : f32 to vector<2x128xf32>
    %16 = arith.addf %15, %14 : vector<2x128xf32>
    %17 = arith.divf %15, %16 : vector<2x128xf32>
    %18 = math.tanh %12 : vector<2x128xf32>
    %19 = vector.extract_strided_slice %17 {offsets = [0, 0], sizes = [2, 32], strides = [1, 1]} : vector<2x128xf32> to vector<2x32xf32>
    %20 = vector.extract_strided_slice %17 {offsets = [0, 32], sizes = [2, 32], strides = [1, 1]} : vector<2x128xf32> to vector<2x32xf32>
    %21 = vector.extract_strided_slice %18 {offsets = [0, 64], sizes = [2, 32], strides = [1, 1]} : vector<2x128xf32> to vector<2x32xf32>
    %22 = vector.extract_strided_slice %17 {offsets = [0, 96], sizes = [2, 32], strides = [1, 1]} : vector<2x128xf32> to vector<2x32xf32>
    %23 = arith.mulf %20, %6 : vector<2x32xf32>
    %24 = arith.mulf %19, %21 : vector<2x32xf32>
    %25 = arith.addf %23, %24 : vector<2x32xf32>
    %26 = math.tanh %25 : vector<2x32xf32>
    %27 = arith.mulf %22, %26 : vector<2x32xf32>
    %c0_12 = arith.constant 0 : index
    %c0_13 = arith.constant 0 : index
    %c0_14 = arith.constant 0 : index
    %c0_15 = arith.constant 0 : index
    %28 = vector.load %arg4[%c0_12, %c0_13, %c0_14, %c0_15] : memref<1x2x8x32xf32, #tpu.memory_space<vmem>>, vector<1x2x1x32xf32>
    %29 = vector.shape_cast %28 : vector<1x2x1x32xf32> to vector<2x32xf32>
    %30 = vector.shape_cast %27 : vector<2x32xf32> to vector<1x2x1x32xf32>
    tpu.vector_store %arg4[%c0_12, %c0_13, %c0_14, %c0_15], %30 {strides = array<i32>} : memref<1x2x8x32xf32, #tpu.memory_space<vmem>>, vector<1x2x1x32xf32>,
    %c0_16 = arith.constant 0 : index
    %c0_17 = arith.constant 0 : index
    %c1 = arith.constant 1 : index
    %c0_18 = arith.constant 0 : index
    %31 = vector.load %arg2[%c0_16, %c0_17, %c1, %c0_18] : memref<1x2x8x128xbf16, #tpu.memory_space<vmem>>, vector<1x2x1x128xbf16>
    %32 = vector.shape_cast %31 : vector<1x2x1x128xbf16> to vector<2x128xbf16>
    %33 = arith.extf %32 : vector<2x128xbf16> to vector<2x128xf32>
    %34 = arith.truncf %27 : vector<2x32xf32> to vector<2x32xbf16>
    %cst_19 = arith.constant dense<0.000000e+00> : vector<2x128xf32>
    %35 = tpu.matmul %34, %4, %cst_19 {dimension_numbers = #tpu.dot_dimension_numbers<[1], [0], [0], [1], [0, 0, 1, 1], [], []>} : vector<2x32xbf16>, vector<32x128xbf16>, vector<2x128xf32> -> vector<2x128xf32>
    %36 = arith.addf %33, %35 : vector<2x128xf32>
    %37 = arith.negf %36 : vector<2x128xf32>
    %38 = math.exp %37 : vector<2x128xf32>
    %cst_20 = arith.constant 1.000000e+00 : f32
    %39 = vector.broadcast %cst_20 : f32 to vector<2x128xf32>
    %40 = arith.addf %39, %38 : vector<2x128xf32>
    %41 = arith.divf %39, %40 : vector<2x128xf32>
    %42 = math.tanh %36 : vector<2x128xf32>
    %43 = vector.extract_strided_slice %41 {offsets = [0, 0], sizes = [2, 32], strides = [1, 1]} : vector<2x128xf32> to vector<2x32xf32>
    %44 = vector.extract_strided_slice %41 {offsets = [0, 32], sizes = [2, 32], strides = [1, 1]} : vector<2x128xf32> to vector<2x32xf32>
    %45 = vector.extract_strided_slice %42 {offsets = [0, 64], sizes = [2, 32], strides = [1, 1]} : vector<2x128xf32> to vector<2x32xf32>
    %46 = vector.extract_strided_slice %41 {offsets = [0, 96], sizes = [2, 32], strides = [1, 1]} : vector<2x128xf32> to vector<2x32xf32>
    %47 = arith.mulf %44, %25 : vector<2x32xf32>
    %48 = arith.mulf %43, %45 : vector<2x32xf32>
    %49 = arith.addf %47, %48 : vector<2x32xf32>
    %50 = math.tanh %49 : vector<2x32xf32>
    %51 = arith.mulf %46, %50 : vector<2x32xf32>
    %c0_21 = arith.constant 0 : index
    %c0_22 = arith.constant 0 : index
    %c1_23 = arith.constant 1 : index
    %c0_24 = arith.constant 0 : index
    %52 = vector.load %arg4[%c0_21, %c0_22, %c1_23, %c0_24] : memref<1x2x8x32xf32, #tpu.memory_space<vmem>>, vector<1x2x1x32xf32>
    %53 = vector.shape_cast %52 : vector<1x2x1x32xf32> to vector<2x32xf32>
    %54 = vector.shape_cast %51 : vector<2x32xf32> to vector<1x2x1x32xf32>
    tpu.vector_store %arg4[%c0_21, %c0_22, %c1_23, %c0_24], %54 {strides = array<i32>} : memref<1x2x8x32xf32, #tpu.memory_space<vmem>>, vector<1x2x1x32xf32>,
    %c0_25 = arith.constant 0 : index
    %c0_26 = arith.constant 0 : index
    %c2 = arith.constant 2 : index
    %c0_27 = arith.constant 0 : index
    %55 = vector.load %arg2[%c0_25, %c0_26, %c2, %c0_27] : memref<1x2x8x128xbf16, #tpu.memory_space<vmem>>, vector<1x2x1x128xbf16>
    %56 = vector.shape_cast %55 : vector<1x2x1x128xbf16> to vector<2x128xbf16>
    %57 = arith.extf %56 : vector<2x128xbf16> to vector<2x128xf32>
    %58 = arith.truncf %51 : vector<2x32xf32> to vector<2x32xbf16>
    %cst_28 = arith.constant dense<0.000000e+00> : vector<2x128xf32>
    %59 = tpu.matmul %58, %4, %cst_28 {dimension_numbers = #tpu.dot_dimension_numbers<[1], [0], [0], [1], [0, 0, 1, 1], [], []>} : vector<2x32xbf16>, vector<32x128xbf16>, vector<2x128xf32> -> vector<2x128xf32>
    %60 = arith.addf %57, %59 : vector<2x128xf32>
    %61 = arith.negf %60 : vector<2x128xf32>
    %62 = math.exp %61 : vector<2x128xf32>
    %cst_29 = arith.constant 1.000000e+00 : f32
    %63 = vector.broadcast %cst_29 : f32 to vector<2x128xf32>
    %64 = arith.addf %63, %62 : vector<2x128xf32>
    %65 = arith.divf %63, %64 : vector<2x128xf32>
    %66 = math.tanh %60 : vector<2x128xf32>
    %67 = vector.extract_strided_slice %65 {offsets = [0, 0], sizes = [2, 32], strides = [1, 1]} : vector<2x128xf32> to vector<2x32xf32>
    %68 = vector.extract_strided_slice %65 {offsets = [0, 32], sizes = [2, 32], strides = [1, 1]} : vector<2x128xf32> to vector<2x32xf32>
    %69 = vector.extract_strided_slice %66 {offsets = [0, 64], sizes = [2, 32], strides = [1, 1]} : vector<2x128xf32> to vector<2x32xf32>
    %70 = vector.extract_strided_slice %65 {offsets = [0, 96], sizes = [2, 32], strides = [1, 1]} : vector<2x128xf32> to vector<2x32xf32>
    %71 = arith.mulf %68, %49 : vector<2x32xf32>
    %72 = arith.mulf %67, %69 : vector<2x32xf32>
    %73 = arith.addf %71, %72 : vector<2x32xf32>
    %74 = math.tanh %73 : vector<2x32xf32>
    %75 = arith.mulf %70, %74 : vector<2x32xf32>
    %c0_30 = arith.constant 0 : index
    %c0_31 = arith.constant 0 : index
    %c2_32 = arith.constant 2 : index
    %c0_33 = arith.constant 0 : index
    %76 = vector.load %arg4[%c0_30, %c0_31, %c2_32, %c0_33] : memref<1x2x8x32xf32, #tpu.memory_space<vmem>>, vector<1x2x1x32xf32>
    %77 = vector.shape_cast %76 : vector<1x2x1x32xf32> to vector<2x32xf32>
    %78 = vector.shape_cast %75 : vector<2x32xf32> to vector<1x2x1x32xf32>
    tpu.vector_store %arg4[%c0_30, %c0_31, %c2_32, %c0_33], %78 {strides = array<i32>} : memref<1x2x8x32xf32, #tpu.memory_space<vmem>>, vector<1x2x1x32xf32>,
    %c0_34 = arith.constant 0 : index
    %c0_35 = arith.constant 0 : index
    %c3 = arith.constant 3 : index
    %c0_36 = arith.constant 0 : index
    %79 = vector.load %arg2[%c0_34, %c0_35, %c3, %c0_36] : memref<1x2x8x128xbf16, #tpu.memory_space<vmem>>, vector<1x2x1x128xbf16>
    %80 = vector.shape_cast %79 : vector<1x2x1x128xbf16> to vector<2x128xbf16>
    %81 = arith.extf %80 : vector<2x128xbf16> to vector<2x128xf32>
    %82 = arith.truncf %75 : vector<2x32xf32> to vector<2x32xbf16>
    %cst_37 = arith.constant dense<0.000000e+00> : vector<2x128xf32>
    %83 = tpu.matmul %82, %4, %cst_37 {dimension_numbers = #tpu.dot_dimension_numbers<[1], [0], [0], [1], [0, 0, 1, 1], [], []>} : vector<2x32xbf16>, vector<32x128xbf16>, vector<2x128xf32> -> vector<2x128xf32>
    %84 = arith.addf %81, %83 : vector<2x128xf32>
    %85 = arith.negf %84 : vector<2x128xf32>
    %86 = math.exp %85 : vector<2x128xf32>
    %cst_38 = arith.constant 1.000000e+00 : f32
    %87 = vector.broadcast %cst_38 : f32 to vector<2x128xf32>
    %88 = arith.addf %87, %86 : vector<2x128xf32>
    %89 = arith.divf %87, %88 : vector<2x128xf32>
    %90 = math.tanh %84 : vector<2x128xf32>
    %91 = vector.extract_strided_slice %89 {offsets = [0, 0], sizes = [2, 32], strides = [1, 1]} : vector<2x128xf32> to vector<2x32xf32>
    %92 = vector.extract_strided_slice %89 {offsets = [0, 32], sizes = [2, 32], strides = [1, 1]} : vector<2x128xf32> to vector<2x32xf32>
    %93 = vector.extract_strided_slice %90 {offsets = [0, 64], sizes = [2, 32], strides = [1, 1]} : vector<2x128xf32> to vector<2x32xf32>
    %94 = vector.extract_strided_slice %89 {offsets = [0, 96], sizes = [2, 32], strides = [1, 1]} : vector<2x128xf32> to vector<2x32xf32>
    %95 = arith.mulf %92, %73 : vector<2x32xf32>
    %96 = arith.mulf %91, %93 : vector<2x32xf32>
    %97 = arith.addf %95, %96 : vector<2x32xf32>
    %98 = math.tanh %97 : vector<2x32xf32>
    %99 = arith.mulf %94, %98 : vector<2x32xf32>
    %c0_39 = arith.constant 0 : index
    %c0_40 = arith.constant 0 : index
    %c3_41 = arith.constant 3 : index
    %c0_42 = arith.constant 0 : index
    %100 = vector.load %arg4[%c0_39, %c0_40, %c3_41, %c0_42] : memref<1x2x8x32xf32, #tpu.memory_space<vmem>>, vector<1x2x1x32xf32>
    %101 = vector.shape_cast %100 : vector<1x2x1x32xf32> to vector<2x32xf32>
    %102 = vector.shape_cast %99 : vector<2x32xf32> to vector<1x2x1x32xf32>
    tpu.vector_store %arg4[%c0_39, %c0_40, %c3_41, %c0_42], %102 {strides = array<i32>} : memref<1x2x8x32xf32, #tpu.memory_space<vmem>>, vector<1x2x1x32xf32>,
    %c0_43 = arith.constant 0 : index
    %c0_44 = arith.constant 0 : index
    %c4 = arith.constant 4 : index
    %c0_45 = arith.constant 0 : index
    %103 = vector.load %arg2[%c0_43, %c0_44, %c4, %c0_45] : memref<1x2x8x128xbf16, #tpu.memory_space<vmem>>, vector<1x2x1x128xbf16>
    %104 = vector.shape_cast %103 : vector<1x2x1x128xbf16> to vector<2x128xbf16>
    %105 = arith.extf %104 : vector<2x128xbf16> to vector<2x128xf32>
    %106 = arith.truncf %99 : vector<2x32xf32> to vector<2x32xbf16>
    %cst_46 = arith.constant dense<0.000000e+00> : vector<2x128xf32>
    %107 = tpu.matmul %106, %4, %cst_46 {dimension_numbers = #tpu.dot_dimension_numbers<[1], [0], [0], [1], [0, 0, 1, 1], [], []>} : vector<2x32xbf16>, vector<32x128xbf16>, vector<2x128xf32> -> vector<2x128xf32>
    %108 = arith.addf %105, %107 : vector<2x128xf32>
    %109 = arith.negf %108 : vector<2x128xf32>
    %110 = math.exp %109 : vector<2x128xf32>
    %cst_47 = arith.constant 1.000000e+00 : f32
    %111 = vector.broadcast %cst_47 : f32 to vector<2x128xf32>
    %112 = arith.addf %111, %110 : vector<2x128xf32>
    %113 = arith.divf %111, %112 : vector<2x128xf32>
    %114 = math.tanh %108 : vector<2x128xf32>
    %115 = vector.extract_strided_slice %113 {offsets = [0, 0], sizes = [2, 32], strides = [1, 1]} : vector<2x128xf32> to vector<2x32xf32>
    %116 = vector.extract_strided_slice %113 {offsets = [0, 32], sizes = [2, 32], strides = [1, 1]} : vector<2x128xf32> to vector<2x32xf32>
    %117 = vector.extract_strided_slice %114 {offsets = [0, 64], sizes = [2, 32], strides = [1, 1]} : vector<2x128xf32> to vector<2x32xf32>
    %118 = vector.extract_strided_slice %113 {offsets = [0, 96], sizes = [2, 32], strides = [1, 1]} : vector<2x128xf32> to vector<2x32xf32>
    %119 = arith.mulf %116, %97 : vector<2x32xf32>
    %120 = arith.mulf %115, %117 : vector<2x32xf32>
    %121 = arith.addf %119, %120 : vector<2x32xf32>
    %122 = math.tanh %121 : vector<2x32xf32>
    %123 = arith.mulf %118, %122 : vector<2x32xf32>
    %c0_48 = arith.constant 0 : index
    %c0_49 = arith.constant 0 : index
    %c4_50 = arith.constant 4 : index
    %c0_51 = arith.constant 0 : index
    %124 = vector.load %arg4[%c0_48, %c0_49, %c4_50, %c0_51] : memref<1x2x8x32xf32, #tpu.memory_space<vmem>>, vector<1x2x1x32xf32>
    %125 = vector.shape_cast %124 : vector<1x2x1x32xf32> to vector<2x32xf32>
    %126 = vector.shape_cast %123 : vector<2x32xf32> to vector<1x2x1x32xf32>
    tpu.vector_store %arg4[%c0_48, %c0_49, %c4_50, %c0_51], %126 {strides = array<i32>} : memref<1x2x8x32xf32, #tpu.memory_space<vmem>>, vector<1x2x1x32xf32>,
    %c0_52 = arith.constant 0 : index
    %c0_53 = arith.constant 0 : index
    %c5 = arith.constant 5 : index
    %c0_54 = arith.constant 0 : index
    %127 = vector.load %arg2[%c0_52, %c0_53, %c5, %c0_54] : memref<1x2x8x128xbf16, #tpu.memory_space<vmem>>, vector<1x2x1x128xbf16>
    %128 = vector.shape_cast %127 : vector<1x2x1x128xbf16> to vector<2x128xbf16>
    %129 = arith.extf %128 : vector<2x128xbf16> to vector<2x128xf32>
    %130 = arith.truncf %123 : vector<2x32xf32> to vector<2x32xbf16>
    %cst_55 = arith.constant dense<0.000000e+00> : vector<2x128xf32>
    %131 = tpu.matmul %130, %4, %cst_55 {dimension_numbers = #tpu.dot_dimension_numbers<[1], [0], [0], [1], [0, 0, 1, 1], [], []>} : vector<2x32xbf16>, vector<32x128xbf16>, vector<2x128xf32> -> vector<2x128xf32>
    %132 = arith.addf %129, %131 : vector<2x128xf32>
    %133 = arith.negf %132 : vector<2x128xf32>
    %134 = math.exp %133 : vector<2x128xf32>
    %cst_56 = arith.constant 1.000000e+00 : f32
    %135 = vector.broadcast %cst_56 : f32 to vector<2x128xf32>
    %136 = arith.addf %135, %134 : vector<2x128xf32>
    %137 = arith.divf %135, %136 : vector<2x128xf32>
    %138 = math.tanh %132 : vector<2x128xf32>
    %139 = vector.extract_strided_slice %137 {offsets = [0, 0], sizes = [2, 32], strides = [1, 1]} : vector<2x128xf32> to vector<2x32xf32>
    %140 = vector.extract_strided_slice %137 {offsets = [0, 32], sizes = [2, 32], strides = [1, 1]} : vector<2x128xf32> to vector<2x32xf32>
    %141 = vector.extract_strided_slice %138 {offsets = [0, 64], sizes = [2, 32], strides = [1, 1]} : vector<2x128xf32> to vector<2x32xf32>
    %142 = vector.extract_strided_slice %137 {offsets = [0, 96], sizes = [2, 32], strides = [1, 1]} : vector<2x128xf32> to vector<2x32xf32>
    %143 = arith.mulf %140, %121 : vector<2x32xf32>
    %144 = arith.mulf %139, %141 : vector<2x32xf32>
    %145 = arith.addf %143, %144 : vector<2x32xf32>
    %146 = math.tanh %145 : vector<2x32xf32>
    %147 = arith.mulf %142, %146 : vector<2x32xf32>
    %c0_57 = arith.constant 0 : index
    %c0_58 = arith.constant 0 : index
    %c5_59 = arith.constant 5 : index
    %c0_60 = arith.constant 0 : index
    %148 = vector.load %arg4[%c0_57, %c0_58, %c5_59, %c0_60] : memref<1x2x8x32xf32, #tpu.memory_space<vmem>>, vector<1x2x1x32xf32>
    %149 = vector.shape_cast %148 : vector<1x2x1x32xf32> to vector<2x32xf32>
    %150 = vector.shape_cast %147 : vector<2x32xf32> to vector<1x2x1x32xf32>
    tpu.vector_store %arg4[%c0_57, %c0_58, %c5_59, %c0_60], %150 {strides = array<i32>} : memref<1x2x8x32xf32, #tpu.memory_space<vmem>>, vector<1x2x1x32xf32>,
    %c0_61 = arith.constant 0 : index
    %c0_62 = arith.constant 0 : index
    %c6 = arith.constant 6 : index
    %c0_63 = arith.constant 0 : index
    %151 = vector.load %arg2[%c0_61, %c0_62, %c6, %c0_63] : memref<1x2x8x128xbf16, #tpu.memory_space<vmem>>, vector<1x2x1x128xbf16>
    %152 = vector.shape_cast %151 : vector<1x2x1x128xbf16> to vector<2x128xbf16>
    %153 = arith.extf %152 : vector<2x128xbf16> to vector<2x128xf32>
    %154 = arith.truncf %147 : vector<2x32xf32> to vector<2x32xbf16>
    %cst_64 = arith.constant dense<0.000000e+00> : vector<2x128xf32>
    %155 = tpu.matmul %154, %4, %cst_64 {dimension_numbers = #tpu.dot_dimension_numbers<[1], [0], [0], [1], [0, 0, 1, 1], [], []>} : vector<2x32xbf16>, vector<32x128xbf16>, vector<2x128xf32> -> vector<2x128xf32>
    %156 = arith.addf %153, %155 : vector<2x128xf32>
    %157 = arith.negf %156 : vector<2x128xf32>
    %158 = math.exp %157 : vector<2x128xf32>
    %cst_65 = arith.constant 1.000000e+00 : f32
    %159 = vector.broadcast %cst_65 : f32 to vector<2x128xf32>
    %160 = arith.addf %159, %158 : vector<2x128xf32>
    %161 = arith.divf %159, %160 : vector<2x128xf32>
    %162 = math.tanh %156 : vector<2x128xf32>
    %163 = vector.extract_strided_slice %161 {offsets = [0, 0], sizes = [2, 32], strides = [1, 1]} : vector<2x128xf32> to vector<2x32xf32>
    %164 = vector.extract_strided_slice %161 {offsets = [0, 32], sizes = [2, 32], strides = [1, 1]} : vector<2x128xf32> to vector<2x32xf32>
    %165 = vector.extract_strided_slice %162 {offsets = [0, 64], sizes = [2, 32], strides = [1, 1]} : vector<2x128xf32> to vector<2x32xf32>
    %166 = vector.extract_strided_slice %161 {offsets = [0, 96], sizes = [2, 32], strides = [1, 1]} : vector<2x128xf32> to vector<2x32xf32>
    %167 = arith.mulf %164, %145 : vector<2x32xf32>
    %168 = arith.mulf %163, %165 : vector<2x32xf32>
    %169 = arith.addf %167, %168 : vector<2x32xf32>
    %170 = math.tanh %169 : vector<2x32xf32>
    %171 = arith.mulf %166, %170 : vector<2x32xf32>
    %c0_66 = arith.constant 0 : index
    %c0_67 = arith.constant 0 : index
    %c6_68 = arith.constant 6 : index
    %c0_69 = arith.constant 0 : index
    %172 = vector.load %arg4[%c0_66, %c0_67, %c6_68, %c0_69] : memref<1x2x8x32xf32, #tpu.memory_space<vmem>>, vector<1x2x1x32xf32>
    %173 = vector.shape_cast %172 : vector<1x2x1x32xf32> to vector<2x32xf32>
    %174 = vector.shape_cast %171 : vector<2x32xf32> to vector<1x2x1x32xf32>
    tpu.vector_store %arg4[%c0_66, %c0_67, %c6_68, %c0_69], %174 {strides = array<i32>} : memref<1x2x8x32xf32, #tpu.memory_space<vmem>>, vector<1x2x1x32xf32>,
    %c0_70 = arith.constant 0 : index
    %c0_71 = arith.constant 0 : index
    %c7 = arith.constant 7 : index
    %c0_72 = arith.constant 0 : index
    %175 = vector.load %arg2[%c0_70, %c0_71, %c7, %c0_72] : memref<1x2x8x128xbf16, #tpu.memory_space<vmem>>, vector<1x2x1x128xbf16>
    %176 = vector.shape_cast %175 : vector<1x2x1x128xbf16> to vector<2x128xbf16>
    %177 = arith.extf %176 : vector<2x128xbf16> to vector<2x128xf32>
    %178 = arith.truncf %171 : vector<2x32xf32> to vector<2x32xbf16>
    %cst_73 = arith.constant dense<0.000000e+00> : vector<2x128xf32>
    %179 = tpu.matmul %178, %4, %cst_73 {dimension_numbers = #tpu.dot_dimension_numbers<[1], [0], [0], [1], [0, 0, 1, 1], [], []>} : vector<2x32xbf16>, vector<32x128xbf16>, vector<2x128xf32> -> vector<2x128xf32>
    %180 = arith.addf %177, %179 : vector<2x128xf32>
    %181 = arith.negf %180 : vector<2x128xf32>
    %182 = math.exp %181 : vector<2x128xf32>
    %cst_74 = arith.constant 1.000000e+00 : f32
    %183 = vector.broadcast %cst_74 : f32 to vector<2x128xf32>
    %184 = arith.addf %183, %182 : vector<2x128xf32>
    %185 = arith.divf %183, %184 : vector<2x128xf32>
    %186 = math.tanh %180 : vector<2x128xf32>
    %187 = vector.extract_strided_slice %185 {offsets = [0, 0], sizes = [2, 32], strides = [1, 1]} : vector<2x128xf32> to vector<2x32xf32>
    %188 = vector.extract_strided_slice %185 {offsets = [0, 32], sizes = [2, 32], strides = [1, 1]} : vector<2x128xf32> to vector<2x32xf32>
    %189 = vector.extract_strided_slice %186 {offsets = [0, 64], sizes = [2, 32], strides = [1, 1]} : vector<2x128xf32> to vector<2x32xf32>
    %190 = vector.extract_strided_slice %185 {offsets = [0, 96], sizes = [2, 32], strides = [1, 1]} : vector<2x128xf32> to vector<2x32xf32>
    %191 = arith.mulf %188, %169 : vector<2x32xf32>
    %192 = arith.mulf %187, %189 : vector<2x32xf32>
    %193 = arith.addf %191, %192 : vector<2x32xf32>
    %194 = math.tanh %193 : vector<2x32xf32>
    %195 = arith.mulf %190, %194 : vector<2x32xf32>
    %c0_75 = arith.constant 0 : index
    %c0_76 = arith.constant 0 : index
    %c7_77 = arith.constant 7 : index
    %c0_78 = arith.constant 0 : index
    %196 = vector.load %arg4[%c0_75, %c0_76, %c7_77, %c0_78] : memref<1x2x8x32xf32, #tpu.memory_space<vmem>>, vector<1x2x1x32xf32>
    %197 = vector.shape_cast %196 : vector<1x2x1x32xf32> to vector<2x32xf32>
    %198 = vector.shape_cast %195 : vector<2x32xf32> to vector<1x2x1x32xf32>
    tpu.vector_store %arg4[%c0_75, %c0_76, %c7_77, %c0_78], %198 {strides = array<i32>} : memref<1x2x8x32xf32, #tpu.memory_space<vmem>>, vector<1x2x1x32xf32>,
    %c0_79 = arith.constant 0 : index
    %c0_80 = arith.constant 0 : index
    %199 = vector.load %arg5[%c0_79, %c0_80] : memref<2x32xf32, #tpu.memory_space<vmem>>, vector<2x32xf32>
    tpu.vector_store %arg5[%c0_79, %c0_80], %195 {strides = array<i32>} : memref<2x32xf32, #tpu.memory_space<vmem>>, vector<2x32xf32>,
    %c0_81 = arith.constant 0 : index
    %c0_82 = arith.constant 0 : index
    %200 = vector.load %arg6[%c0_81, %c0_82] : memref<2x32xf32, #tpu.memory_space<vmem>>, vector<2x32xf32>
    tpu.vector_store %arg6[%c0_81, %c0_82], %193 {strides = array<i32>} : memref<2x32xf32, #tpu.memory_space<vmem>>, vector<2x32xf32>,
    return
  }
  func.func @transform_0(%arg0: i32, %arg1: i32) -> (i32, i32, i32, i32) {
    %c0_i32 = arith.constant 0 : i32
    %c0_i32_0 = arith.constant 0 : i32
    %c0_i32_1 = arith.constant 0 : i32
    return %arg0, %c0_i32, %arg1, %c0_i32_0 : i32, i32, i32, i32
  }
  func.func @transform_1(%arg0: i32, %arg1: i32) -> (i32, i32, i32) {
    %c0_i32 = arith.constant 0 : i32
    %c0_i32_0 = arith.constant 0 : i32
    %c0_i32_1 = arith.constant 0 : i32
    return %arg0, %c0_i32, %c0_i32_0 : i32, i32, i32
  }
  func.func @transform_2(%arg0: i32, %arg1: i32) -> (i32, i32, i32, i32) {
    %c0_i32 = arith.constant 0 : i32
    %c0_i32_0 = arith.constant 0 : i32
    %c0_i32_1 = arith.constant 0 : i32
    return %arg0, %c0_i32, %arg1, %c0_i32_0 : i32, i32, i32, i32
  }
}

</mosaic_0001>

<bundles_post_ra>
// kernel: reblstm_forward.1
= control target key start
LH: loop header
LB: loop body
LE: loop exit
PB: predicated region body
PF: predicated region fallthrough
CT: control target
= control target key end

     0   :  { %s1837_s9 = smov 0   ;;  %s1839_s10 = smov 0   ;;  %s2232_s0 = inlined_call_operand.vmem [shape: bf16[2,2,32,128], index: 0, kind: input, shape index: {}]   ;;  %s2233_s1 = inlined_call_operand.vmem [shape: bf16[2,32,128], index: 1, kind: input, shape index: {}]   ;;  %s2234_s2 = inlined_call_operand.vmem [shape: f32[2,2,32,32], index: 2, kind: output, shape index: {}]  }
   0x1   :  { %s1841_s11 = smov 0   ;;  %s1843_s12 = smov 0  }
   0x2   :  { %s1845_s13 = smov 0   ;;  %s1847_s14 = smov 0  }
   0x3   :  { %s1849_s15 = smov 0  }
   0x4 LB: > { %s21_s16 = sadd.s32 1, %s1806_s13  ;;  %s24_s17 = sadd.s32 1, %s1810_s14  ;;  %s1814_s15 = sphi %s1849_s15, %s12_s15   ;;  %s1810_s14 = sphi %s1847_s14, %s2241_s14   ;;  %s1806_s13 = sphi %s1845_s13, %s2240_s13   ;;  %s1802_s12 = sphi %s1843_s12, %s2239_s12   ;;  %s1798_s11 = sphi %s1841_s11, %s2238_s11   ;;  %s1794_s10 = sphi %s1839_s10, %s2237_s10   ;;  %s1790_s9 = sphi %s1837_s9, %s2236_s9  }
   0x5   : > { %p22_p0 = scmp.ge.s32.totalorder %s21_s16, 4  ;;  %s1435_s18 = sadd.s32 4294967295, %s1814_s15  }
   0x6   : > { %p40_p1 = scmp.ne.s32.totalorder %s1794_s10, %s1790_s9  ;;  %p41_p2 = scmp.eq.s32.totalorder %s1814_s15, 0 }
   0x7   : > { %s2243_s16 = smov (%p22_p0, %s21_s16), 0  ;;  %s2245_s17 = smov (!%p22_p0, %s24_s17), %s1810_s14 }
   0x8   : > { %p26_p3 = scmp.ge.s32.totalorder %s2245_s17, 2  ;;  %p98_p4 = scmp.eq.s32.totalorder %s1435_s18, 7 }
   0x9   : > { %s29_s19 = ssub.s32 %s1806_s13, %s2243_s16  ;;  %p42_p5 = por %p41_p2, %p40_p1 }
   0xa   : > { %s2247_s17 = smov (%p26_p3, %s2245_s17), 0  ;;  %p1885_p6 = por %p98_p4, %p40_p1 }
   0xb   : > { %s28_s21 = ssub.s32 %s1810_s14, %s2247_s17  ;;  %s33_s23 = sadd.s32 1, %s1794_s10 }
   0xc   : > { %s30_s22 = sor.u32 %s29_s19, %s28_s21  ;;  %p1438_p8 = scmp.ge.s32.totalorder %s1814_s15, 8 }
   0xd   : > { %p31_p7 = scmp.eq.s32.totalorder %s30_s22, 0 }
   0xe   : > { %120 = sbr.rel (%p1438_p8) target bundleno = 26 (0x1a), region = 16 }
   0xf   : > { %s1893_s24 = scalar_select %p31_p7, %s1794_s10, %s33_s23  }
  0x13   : > { %123 = sbr.rel (!%p42_p5) target bundleno = 26 (0x1a), region = 20  ;;  %s125_s25 = sand.u32 (%p42_p5), 1, %s1794_s10  }
  0x14   : > { %s1440_s26 = sshll.u32 (%p42_p5), %s1810_s14, 3  ;;  %s1439_s27 = sshll.u32 (%p42_p5), %s125_s25, 3 }
  0x15   : > { %s129_s28 = sadd.s32 (%p42_p5), %s1806_s13, %s1440_s26  ;;  %s127_s5 = scalar_lea.vmem (%p42_p5), [#allocation4], %s1439_s27 }
  0x16   : > { %s1441_s29 = sshll.u32 (%p42_p5), %s129_s28, 2 }
  0x17   : > { %s131_s4 = scalar_lea.vmem (%p42_p5), %s2232_s0, %s1441_s29 }
  0x18   : > { %v148_v0 = vld [vmem:[%s131_s4] sm:$0xf]  ;;  %v150_v1 = vld [vmem:[%s131_s4 + $0x10] sm:$0xf] }
  0x19   : > { %149 = vst [vmem:[%s127_s5] sm:$0xf] %v148_v0  ;;  %151 = vst [vmem:[%s127_s5 + $0x4] sm:$0xf] %v150_v1 }
  0x1a PF: > { %p1442_p9 = scmp.ge.s32.totalorder %s1814_s15, 1  ;;  %p186_p10 = scmp.lt.s32.totalorder %s1814_s15, 9 }
  0x1c   : > { %p187_p11 = pnand %p1442_p9, %p186_p10 }
  0x1d   : > { %s193_s6 = sand.u32 (!%p187_p11), 1, %s1790_s9   ;;  %p218_p12 = scmp.lt.s32.totalorder (!%p187_p11), %s1802_s12, 1 }
  0x1e   : > { %190 = sbr.rel (%p187_p11) target bundleno = 5660 (0x161c), region = 65  ;;  %s1443_s7 = sshll.u32 (!%p187_p11), %s193_s6, 3 }
  0x1f   : > { %s1444_s8 = sshll.u32 (!%p187_p11), %s193_s6, 4  ;;  %s1910_s25 = scalar_lea.vmem (!%p187_p11), [#allocation4], %s1443_s7 }
  0x20   : > { %s1912_s26 = scalar_lea.vmem (!%p187_p11), [#allocation5], %s1444_s8  ;;  %p1447_p13 = scmp.ne.s32.totalorder (!%p187_p11), %s1798_s11, 0 }
  0x23   : > { %s219_s18 = scalar_select %p218_p12, %s1802_s12, 1 }
  0x24   : > { %227 = sbr.rel (%p1447_p13) target bundleno = 43 (0x2b), region = 73 }
  0x25   : > { %s1479_s19 = sshll.u32 %s219_s18, 4 }
  0x26   : > { %s222_s23 = scalar_lea.vmem %s2233_s1, %s1479_s19 }
  0x29   : > { %vm228_vm0 = vcmask 254976   ;;  %v1816_v2 = vmov 0.0  }
  0x2a   : > { %229 = vst.msk [vmem:[#allocation2] sm:$0x3] %vm228_vm0, %v1816_v2  ;;  %230 = vst.msk [vmem:[#allocation3] sm:$0x3] %vm228_vm0, %v1816_v2 }
  0x2b PF: > { %v1915_v3 = vld [vmem:[%s222_s23 + $0x8] sm:$0xff]   ;;  %v1817_v4 = vmov 0.0   ;;  %v1920_v5 = vld [vmem:[%s222_s23] sm:$0xff]   ;;  %vm1818_vm1 = vmmov 0   ;;  %s1819_s9 = smov 32   ;;  %vm254_vm2 = vcmask 261120  }
  0x2c   : > { %1504 = vmatprep.subr.bf16.mxu0 %v1817_v4  ;;  %1512 = vmatprep.subr.bf16.mxu1 %v1817_v4  ;;  %v238_v10 = vld [vmem:[%s1910_s25 + $0x4] sm:$0x1]  ;;  %v237_v11 = vld [vmem:[%s1910_s25] sm:$0x1]  ;;  %s1820_s27 = smov 64   ;;  %vm382_vm3 = vcmask 1041409  }
  0x2d   : > { %1505 = vmatpush3.bf16.msra.mxu0 %v1915_v3  ;;  %1508 = vmatprep.mubr.msk.bf16.mxu0 %vm1818_vm1, %v1817_v4  ;;  %v240_v12 = vunpack.c.l.bf16 %v238_v10  ;;  %v239_v15 = vunpack.c.l.bf16 %v237_v11  ;;  %v372_v57 = vld [vmem:[%s1910_s25 + $0x4] sm:$0x1]  ;;  %v371_v58 = vld [vmem:[%s1910_s25] sm:$0x1]  ;;  %vm368_vm4 = vcmask 253952   ;;  %vm498_vm5 = vcmask 254977  }
  0x2e   : > { %1506 = vmatprep.subr.bf16.mxu0 %v1817_v4  ;;  %1513 = vmatpush3.bf16.msra.mxu1 %v1915_v3  ;;  %v374_v59 = vunpack.c.l.bf16 %v372_v57  ;;  %v373_v60 = vunpack.c.l.bf16 %v371_v58  ;;  %s1821_s28 = smov 96   ;;  %vm628_vm6 = vcmask 256002   ;;  %vm759_vm7 = vcmask 257027   ;;  %s1475_s29 = sshll.u32 (%p1885_p6), %s1802_s12, 3 }
  0x2f   : > { %1514 = vmatprep.subr.bf16.mxu1 %v1817_v4  ;;  %1516 = vmatprep.mubr.msk.bf16.mxu1 %vm1818_vm1, %v1817_v4  ;;  %vm890_vm8 = vcmask 258052   ;;  %vm1021_vm9 = vcmask 259077   ;;  %vm1152_vm10 = vcmask 260102   ;;  %vm1283_vm11 = vcmask 261127   ;;  %s1311_s30 = sadd.s32 (%p1885_p6), %s1798_s11, %s1475_s29 }
  0x30   : > { %s1476_s3 = sshll.u32 (%p1885_p6), %s1311_s30, 3 }
  0x31   : > { %v235_v6 = vld [vmem:[#allocation2] sm:$0x3]  ;;  %v236_v7 = vld [vmem:[#allocation3] sm:$0x3]  ;;  %1507 = vmatpush3.bf16.msra.mxu0 %v1920_v5  ;;  %s1313_s6 = scalar_lea.vmem (%p1885_p6), %s2234_s2, %s1476_s3 }
  0x32   : > { %v319_v8 = vrot.slane %v236_v7, 1  ;;  %v241_v9 = vpack.c.bf16 %v235_v6, %v235_v6  ;;  %1515 = vmatpush3.bf16.msra.mxu1 %v1920_v5  ;;  %1520 = vmatprep.subr.bf16.mxu0 %v1817_v4 }
  0x33   : > { %1528 = vmatprep.subr.bf16.mxu1 %v1817_v4 }
  0x34   : > { %322 = vrot.lane.b32.xlu1 %v319_v8, %s1819_s9  ;;  %1509 = vmatmul.mubr.msk.bf16.vlgmr.msra.gmra.mxu0 %vm254_vm2, %v241_v9 }
  0x35   : > { %1521 = vmatpush3.bf16.msra.mxu0 %v1915_v3  ;;  %1524 = vmatprep.mubr.msk.bf16.mxu0 %vm1818_vm1, %v1817_v4 }
  0x36   : > { %1522 = vmatprep.subr.bf16.mxu0 %v1817_v4 }
  0x38   : > { %320 = vrot.lane.b32.xlu1 %v236_v7, %s1819_s9 }
  0x39   : > { %1523 = vmatpush3.bf16.msra.mxu0 %v1920_v5 }
  0x3a   : > { %1536 = vmatprep.subr.bf16.mxu0 %v1817_v4 }
  0xa6   : > { %v323_v35 = vpop.permute.xlu1 %322 }
  0xaa   : > { %v321_v37 = vpop.permute.xlu1 %320 }
  0xf4   : > { %v292_v13 = vpop.f32.mrf.mxu0 }
  0xf5   : > { %v299_v14 = vrot.slane %v292_v13, 1  ;;  %v302_v19 = vadd.f32 %v292_v13, %v239_v15 }
  0xf6   : > { %v1510_v16 = vpop.f32.mrf.mxu0 }
  0xf7   : > { %v303_v17 = vadd.f32 %v299_v14, %v240_v12  ;;  %v1451_v24 = vmul.f32 -1.442695, %v302_v19 }
  0xf8   : > { %v295_v18 = vpop.f32.mrf.mxu0 }
  0xf9   : > { %1632 = vtanh.f32 %v303_v17  ;;  %v1452_v23 = vmul.f32 -1.442695, %v303_v17 }
  0xfa   : > { %v1511_v20 = vpop.f32.mrf.mxu0  ;;  %1634 = vtanh.f32 %v302_v19 }
  0xfb   : > { %1636 = vpow2.f32 %v1452_v23 }
  0xfc   : > { %1638 = vpow2.f32 %v1451_v24 }
 0x106   : > { %v1633_v21 = vpop.eup %1632 }
 0x107   : > { %332 = vrot.lane.b32.xlu0 %v1633_v21, %s1820_s27  ;;  %v1635_v22 = vpop.eup %1634 }
 0x108   : > { %v1637_v25 = vpop.eup %1636 }
 0x109   : > { %v311_v26 = vadd.f32 1.0, %v1637_v25  ;;  %v1639_v27 = vpop.eup %1638 }
 0x10a   : > { %v310_v28 = vadd.f32 1.0, %v1639_v27 }
 0x10b   : > { %330 = vrot.lane.b32.xlu0 %v1635_v22, %s1820_s27  ;;  %1640 = vrcp.f32 %v311_v26 }
 0x10c   : > { %1642 = vrcp.f32 %v310_v28 }
 0x118   : > { %v1641_v29 = vpop.eup %1640 }
 0x119   : > { %v1643_v32 = vpop.eup %1642  ;;  %v327_v36 = vmul.f32 %v1641_v29, %v323_v35 }
 0x11a   : > { %v326_v40 = vmul.f32 %v1643_v32, %v321_v37 }
 0x179   : > { %v333_v30 = vpop.permute.xlu0 %332 }
 0x17a   : > { %v337_v31 = vmul.f32 %v1641_v29, %v333_v30 }
 0x17c   : > { %342 = vrot.lane.b32.xlu0 %v337_v31, %s1819_s9 }
 0x17d   : > { %v331_v33 = vpop.permute.xlu0 %330 }
 0x17e   : > { %v336_v34 = vmul.f32 %v1643_v32, %v331_v33 }
 0x180   : > { %340 = vrot.lane.b32.xlu1 %v336_v34, %s1819_s9 }
 0x1ee   : > { %v343_v38 = vpop.permute.xlu0 %342 }
 0x1ef   : > { %v1948_v39 = vadd.f32 %v343_v38, %v327_v36 }
 0x1f1   : > { %1644 = vtanh.f32 %v1948_v39  ;;  %v453_v21 = vrot.slane %v1948_v39, 7 }
 0x1f2   : > { %v341_v41 = vpop.permute.xlu1 %340 }
 0x1f3   : > { %v1951_v42 = vadd.f32 %v341_v41, %v326_v40 }
 0x1f5   : > { %1646 = vtanh.f32 %v1951_v42  ;;  %v452_v23 = vrot.slane %v1951_v42, 7 }
 0x1fe   : > { %v1645_v43 = vpop.eup %1644 }
 0x1ff   : > { %354 = vrot.lane.b32.xlu0 %v1645_v43, %s1820_s27  ;;  %v501_v43 = vld [vmem:[%s1910_s25] sm:$0x2] }
 0x202   : > { %v1647_v44 = vpop.eup %1646 }
 0x203   : > { %352 = vrot.lane.b32.xlu1 %v1647_v44, %s1820_s27  ;;  %v502_v44 = vld [vmem:[%s1910_s25 + $0x4] sm:$0x2] }
 0x271   : > { %v355_v45 = vpop.permute.xlu0 %354 }
 0x272   : > { %v1956_v46 = vmul.f32 %v1641_v29, %v355_v45  ;;  %v503_v45 = vunpack.c.l.bf16 %v501_v43 }
 0x274   : > { %v376_v47 = vpack.c.bf16 %v1956_v46, %v1956_v46 }
 0x275   : > { %v353_v48 = vpop.permute.xlu1 %352 }
 0x276   : > { %v380_v49 = vunpack.c.l.b16 %v376_v47  ;;  %v1960_v50 = vmul.f32 %v1643_v32, %v353_v48  ;;  %v504_v47 = vunpack.c.l.bf16 %v502_v44 }
 0x278   : > { %v375_v51 = vpack.c.bf16 %v1960_v50, %v1960_v50  ;;  %v381_v52 = vrot.slane %v380_v49, 7 }
 0x27a   : > { %v379_v53 = vunpack.c.l.b16 %v375_v51 }
 0x27c   : > { %v383_v54 = vsel %vm382_vm3, %v381_v52, %v379_v53 }
 0x27d   : > { %v384_v55 = vpack.c.b16 %v383_v54, %v383_v54 }
 0x27f   : > { %385 = vrot.lane.b32.xlu0 %v384_v55, %s1819_s9 }
 0x2f1   : > { %v386_v56 = vpop.permute.xlu0 %385 }
 0x2f2   : > { %1517 = vmatmul.mubr.msk.bf16.vlgmr.msra.gmra.mxu1 %vm254_vm2, %v386_v56 }
 0x2f3   : > { %1529 = vmatpush3.bf16.msra.mxu1 %v1915_v3  ;;  %1532 = vmatprep.mubr.msk.bf16.mxu1 %vm1818_vm1, %v1817_v4 }
 0x2f4   : > { %1530 = vmatprep.subr.bf16.mxu1 %v1817_v4 }
 0x2f7   : > { %1531 = vmatpush3.bf16.msra.mxu1 %v1920_v5 }
 0x2f8   : > { %1544 = vmatprep.subr.bf16.mxu1 %v1817_v4 }
 0x3b2   : > { %v424_v61 = vpop.f32.mrf.mxu1 }
 0x3b3   : > { %v431_v62 = vrot.slane %v424_v61, 7  ;;  %v435_v63 = vadd.f32 %v424_v61, %v374_v59 }
 0x3b4   : > { %v1518_v0 = vpop.f32.mrf.mxu1 }
 0x3b5   : > { %v434_v1 = vadd.f32 %v431_v62, %v373_v60  ;;  %1648 = vtanh.f32 %v435_v63  ;;  %v1455_v9 = vmul.f32 -1.442695, %v435_v63 }
 0x3b6   : > { %v427_v2 = vpop.f32.mrf.mxu1 }
 0x3b7   : > { %1650 = vtanh.f32 %v434_v1  ;;  %v1454_v10 = vmul.f32 -1.442695, %v434_v1 }
 0x3b8   : > { %v1519_v6 = vpop.f32.mrf.mxu1  ;;  %1652 = vpow2.f32 %v1455_v9 }
 0x3b9   : > { %1654 = vpow2.f32 %v1454_v10 }
 0x3c2   : > { %v1649_v7 = vpop.eup %1648 }
 0x3c3   : > { %462 = vrot.lane.b32.xlu0 %v1649_v7, %s1820_s27 }
 0x3c4   : > { %v1651_v8 = vpop.eup %1650 }
 0x3c5   : > { %460 = vrot.lane.b32.xlu1 %v1651_v8, %s1820_s27  ;;  %v1653_v11 = vpop.eup %1652 }
 0x3c6   : > { %v1655_v12 = vpop.eup %1654  ;;  %v443_v13 = vadd.f32 1.0, %v1653_v11 }
 0x3c7   : > { %v442_v14 = vadd.f32 1.0, %v1655_v12 }
 0x3c8   : > { %1656 = vrcp.f32 %v443_v13 }
 0x3c9   : > { %1658 = vrcp.f32 %v442_v14 }
 0x3d5   : > { %v1657_v15 = vpop.eup %1656 }
 0x3d6   : > { %v1659_v18 = vpop.eup %1658  ;;  %v457_v22 = vmul.f32 %v1657_v15, %v453_v21 }
 0x3d7   : > { %v456_v26 = vmul.f32 %v1659_v18, %v452_v23 }
 0x435   : > { %v463_v16 = vpop.permute.xlu0 %462 }
 0x436   : > { %v467_v17 = vmul.f32 %v1657_v15, %v463_v16 }
 0x437   : > { %v461_v19 = vpop.permute.xlu1 %460 }
 0x438   : > { %472 = vrot.lane.b32.xlu0 %v467_v17, %s1819_s9  ;;  %v466_v20 = vmul.f32 %v1659_v18, %v461_v19 }
 0x43a   : > { %470 = vrot.lane.b32.xlu1 %v466_v20, %s1819_s9 }
 0x4aa   : > { %v473_v24 = vpop.permute.xlu0 %472 }
 0x4ab   : > { %v1981_v25 = vadd.f32 %v473_v24, %v457_v22 }
 0x4ac   : > { %v471_v27 = vpop.permute.xlu1 %470 }
 0x4ad   : > { %1660 = vtanh.f32 %v1981_v25  ;;  %v1984_v28 = vadd.f32 %v471_v27, %v456_v26  ;;  %v583_v11 = vrot.slane %v1981_v25, 7 }
 0x4af   : > { %1662 = vtanh.f32 %v1984_v28  ;;  %v582_v10 = vrot.slane %v1984_v28, 7 }
 0x4ba   : > { %v1661_v29 = vpop.eup %1660 }
 0x4bb   : > { %484 = vrot.lane.b32.xlu0 %v1661_v29, %s1820_s27 }
 0x4bc   : > { %v1663_v30 = vpop.eup %1662 }
 0x4bd   : > { %482 = vrot.lane.b32.xlu1 %v1663_v30, %s1820_s27 }
 0x52d   : > { %v485_v31 = vpop.permute.xlu0 %484 }
 0x52e   : > { %v1989_v32 = vmul.f32 %v1657_v15, %v485_v31 }
 0x52f   : > { %v483_v33 = vpop.permute.xlu1 %482 }
 0x530   : > { %v1991_v34 = vmul.f32 %v1659_v18, %v483_v33  ;;  %v506_v35 = vpack.c.bf16 %v1989_v32, %v1989_v32 }
 0x532   : > { %v505_v36 = vpack.c.bf16 %v1991_v34, %v1991_v34  ;;  %v510_v38 = vunpack.c.l.b16 %v506_v35  ;;  %v631_v35 = vld [vmem:[%s1910_s25] sm:$0x2] }
 0x534   : > { %v509_v37 = vunpack.c.l.b16 %v505_v36  ;;  %v632_v36 = vld [vmem:[%s1910_s25 + $0x4] sm:$0x2] }
 0x536   : > { %v511_v39 = vrot.slane %v509_v37, 1  ;;  %v633_v37 = vunpack.c.l.bf16 %v631_v35 }
 0x538   : > { %v512_v40 = vsel %vm382_vm3, %v510_v38, %v511_v39  ;;  %v634_v38 = vunpack.c.l.bf16 %v632_v36 }
 0x539   : > { %v513_v41 = vpack.c.b16 %v512_v40, %v512_v40 }
 0x53b   : > { %514 = vrot.lane.b32.xlu1 %v513_v41, %s1819_s9 }
 0x5ad   : > { %v515_v42 = vpop.permute.xlu1 %514 }
 0x5ae   : > { %1525 = vmatmul.mubr.msk.bf16.vlgmr.msra.gmra.mxu0 %vm254_vm2, %v515_v42 }
 0x5af   : > { %1537 = vmatpush3.bf16.msra.mxu0 %v1915_v3  ;;  %1540 = vmatprep.mubr.msk.bf16.mxu0 %vm1818_vm1, %v1817_v4 }
 0x5b0   : > { %1538 = vmatprep.subr.bf16.mxu0 %v1817_v4 }
 0x5b3   : > { %1539 = vmatpush3.bf16.msra.mxu0 %v1920_v5 }
 0x5b4   : > { %1552 = vmatprep.subr.bf16.mxu0 %v1817_v4 }
 0x66e   : > { %v553_v48 = vpop.f32.mrf.mxu0 }
 0x66f   : > { %v560_v49 = vrot.slane %v553_v48, 6  ;;  %v561_v51 = vrot.slane %v553_v48, 7 }
 0x670   : > { %v1526_v52 = vpop.f32.mrf.mxu0 }
 0x671   : > { %v564_v53 = vadd.f32 %v560_v49, %v503_v45  ;;  %v565_v54 = vadd.f32 %v561_v51, %v504_v47 }
 0x672   : > { %v556_v55 = vpop.f32.mrf.mxu0 }
 0x673   : > { %1664 = vtanh.f32 %v564_v53  ;;  %v1457_v59 = vmul.f32 -1.442695, %v564_v53  ;;  %v1458_v60 = vmul.f32 -1.442695, %v565_v54 }
 0x674   : > { %1666 = vtanh.f32 %v565_v54  ;;  %v1527_v56 = vpop.f32.mrf.mxu0 }
 0x675   : > { %1668 = vpow2.f32 %v1457_v59 }
 0x676   : > { %1670 = vpow2.f32 %v1458_v60 }
 0x680   : > { %v1665_v57 = vpop.eup %1664 }
 0x681   : > { %v1667_v58 = vpop.eup %1666  ;;  %590 = vrot.lane.b32.xlu0 %v1665_v57, %s1820_s27 }
 0x682   : > { %592 = vrot.lane.b32.xlu1 %v1667_v58, %s1820_s27  ;;  %v1669_v61 = vpop.eup %1668 }
 0x683   : > { %v1671_v62 = vpop.eup %1670  ;;  %v572_v63 = vadd.f32 1.0, %v1669_v61 }
 0x684   : > { %v573_v0 = vadd.f32 1.0, %v1671_v62 }
 0x685   : > { %1672 = vrcp.f32 %v572_v63 }
 0x686   : > { %1674 = vrcp.f32 %v573_v0 }
 0x692   : > { %v1673_v1 = vpop.eup %1672 }
 0x693   : > { %v1675_v6 = vpop.eup %1674  ;;  %v586_v12 = vmul.f32 %v1673_v1, %v582_v10 }
 0x694   : > { %v587_v13 = vmul.f32 %v1675_v6, %v583_v11 }
 0x6f3   : > { %v591_v2 = vpop.permute.xlu0 %590 }
 0x6f4   : > { %v593_v7 = vpop.permute.xlu1 %592  ;;  %v596_v8 = vmul.f32 %v1673_v1, %v591_v2 }
 0x6f5   : > { %v597_v9 = vmul.f32 %v1675_v6, %v593_v7 }
 0x6f6   : > { %600 = vrot.lane.b32.xlu0 %v596_v8, %s1819_s9 }
 0x6f7   : > { %602 = vrot.lane.b32.xlu1 %v597_v9, %s1819_s9 }
 0x768   : > { %v601_v14 = vpop.permute.xlu0 %600 }
 0x769   : > { %v603_v15 = vpop.permute.xlu1 %602  ;;  %v2014_v16 = vadd.f32 %v601_v14, %v586_v12 }
 0x76a   : > { %v2016_v17 = vadd.f32 %v603_v15, %v587_v13 }
 0x76b   : > { %1676 = vtanh.f32 %v2014_v16  ;;  %v713_v63 = vrot.slane %v2014_v16, 7 }
 0x76c   : > { %1678 = vtanh.f32 %v2016_v17  ;;  %v714_v0 = vrot.slane %v2016_v17, 7 }
 0x778   : > { %v1677_v18 = vpop.eup %1676 }
 0x779   : > { %v1679_v19 = vpop.eup %1678  ;;  %612 = vrot.lane.b32.xlu0 %v1677_v18, %s1820_s27 }
 0x77a   : > { %614 = vrot.lane.b32.xlu1 %v1679_v19, %s1820_s27 }
 0x7eb   : > { %v613_v20 = vpop.permute.xlu0 %612 }
 0x7ec   : > { %v615_v21 = vpop.permute.xlu1 %614  ;;  %v2022_v22 = vmul.f32 %v1673_v1, %v613_v20 }
 0x7ed   : > { %v2024_v23 = vmul.f32 %v1675_v6, %v615_v21 }
 0x7ee   : > { %v635_v24 = vpack.c.bf16 %v2022_v22, %v2022_v22 }
 0x7ef   : > { %v636_v25 = vpack.c.bf16 %v2024_v23, %v2024_v23 }
 0x7f0   : > { %v639_v26 = vunpack.c.l.b16 %v635_v24 }
 0x7f1   : > { %v640_v27 = vunpack.c.l.b16 %v636_v25 }
 0x7f2   : > { %v641_v28 = vrot.slane %v639_v26, 2 }
 0x7f3   : > { %v642_v29 = vrot.slane %v640_v27, 1  ;;  %v762_v27 = vld [vmem:[%s1910_s25] sm:$0x4] }
 0x7f5   : > { %v643_v30 = vsel %vm382_vm3, %v642_v29, %v641_v28  ;;  %v763_v28 = vld [vmem:[%s1910_s25 + $0x4] sm:$0x4]  ;;  %v764_v29 = vunpack.c.l.bf16 %v762_v27 }
 0x7f6   : > { %v644_v31 = vpack.c.b16 %v643_v30, %v643_v30  ;;  %v765_v30 = vunpack.c.l.bf16 %v763_v28 }
 0x7f8   : > { %645 = vrot.lane.b32.xlu0 %v644_v31, %s1819_s9 }
 0x86a   : > { %v646_v33 = vpop.permute.xlu0 %645 }
 0x86b   : > { %1533 = vmatmul.mubr.msk.bf16.vlgmr.msra.gmra.mxu1 %vm254_vm2, %v646_v33 }
 0x86c   : > { %1545 = vmatpush3.bf16.msra.mxu1 %v1915_v3  ;;  %1548 = vmatprep.mubr.msk.bf16.mxu1 %vm1818_vm1, %v1817_v4 }
 0x86d   : > { %1546 = vmatprep.subr.bf16.mxu1 %v1817_v4 }
 0x870   : > { %1547 = vmatpush3.bf16.msra.mxu1 %v1920_v5 }
 0x871   : > { %1560 = vmatprep.subr.bf16.mxu1 %v1817_v4 }
 0x92b   : > { %v684_v39 = vpop.f32.mrf.mxu1 }
 0x92c   : > { %v691_v40 = vrot.slane %v684_v39, 5  ;;  %v692_v41 = vrot.slane %v684_v39, 6 }
 0x92d   : > { %v1534_v42 = vpop.f32.mrf.mxu1 }
 0x92e   : > { %v695_v43 = vadd.f32 %v691_v40, %v633_v37  ;;  %v696_v44 = vadd.f32 %v692_v41, %v634_v38 }
 0x92f   : > { %v687_v45 = vpop.f32.mrf.mxu1 }
 0x930   : > { %1680 = vtanh.f32 %v695_v43  ;;  %v1460_v51 = vmul.f32 -1.442695, %v695_v43  ;;  %v1461_v52 = vmul.f32 -1.442695, %v696_v44 }
 0x931   : > { %1682 = vtanh.f32 %v696_v44  ;;  %v1535_v47 = vpop.f32.mrf.mxu1 }
 0x932   : > { %1684 = vpow2.f32 %v1460_v51 }
 0x933   : > { %1686 = vpow2.f32 %v1461_v52 }
 0x93d   : > { %v1681_v48 = vpop.eup %1680 }
 0x93e   : > { %v1683_v49 = vpop.eup %1682  ;;  %721 = vrot.lane.b32.xlu1 %v1681_v48, %s1820_s27 }
 0x93f   : > { %723 = vrot.lane.b32.xlu0 %v1683_v49, %s1820_s27  ;;  %v1685_v53 = vpop.eup %1684 }
 0x940   : > { %v1687_v54 = vpop.eup %1686  ;;  %v703_v55 = vadd.f32 1.0, %v1685_v53 }
 0x941   : > { %v704_v56 = vadd.f32 1.0, %v1687_v54 }
 0x942   : > { %1688 = vrcp.f32 %v703_v55 }
 0x943   : > { %1690 = vrcp.f32 %v704_v56 }
 0x94f   : > { %v1689_v57 = vpop.eup %1688 }
 0x950   : > { %v1691_v59 = vpop.eup %1690  ;;  %v717_v1 = vmul.f32 %v1689_v57, %v713_v63 }
 0x951   : > { %v718_v2 = vmul.f32 %v1691_v59, %v714_v0 }
 0x9b0   : > { %v722_v58 = vpop.permute.xlu1 %721 }
 0x9b1   : > { %v724_v60 = vpop.permute.xlu0 %723  ;;  %v727_v61 = vmul.f32 %v1689_v57, %v722_v58 }
 0x9b2   : > { %v728_v62 = vmul.f32 %v1691_v59, %v724_v60 }
 0x9b3   : > { %731 = vrot.lane.b32.xlu1 %v727_v61, %s1819_s9 }
 0x9b4   : > { %733 = vrot.lane.b32.xlu0 %v728_v62, %s1819_s9 }
 0xa25   : > { %v732_v6 = vpop.permute.xlu1 %731 }
 0xa26   : > { %v734_v7 = vpop.permute.xlu0 %733  ;;  %v2047_v8 = vadd.f32 %v732_v6, %v717_v1 }
 0xa27   : > { %v2049_v9 = vadd.f32 %v734_v7, %v718_v2 }
 0xa28   : > { %1692 = vtanh.f32 %v2047_v8 }
 0xa29   : > { %1694 = vtanh.f32 %v2049_v9  ;;  %v845_v58 = vrot.slane %v2049_v9, 7 }
 0xa35   : > { %v1693_v10 = vpop.eup %1692 }
 0xa36   : > { %v1695_v11 = vpop.eup %1694  ;;  %743 = vrot.lane.b32.xlu1 %v1693_v10, %s1820_s27 }
 0xa37   : > { %745 = vrot.lane.b32.xlu0 %v1695_v11, %s1820_s27 }
 0xaa8   : > { %v744_v12 = vpop.permute.xlu1 %743 }
 0xaa9   : > { %v746_v13 = vpop.permute.xlu0 %745  ;;  %v2055_v14 = vmul.f32 %v1689_v57, %v744_v12  ;;  %v844_v57 = vrot.slane %v2047_v8, 7 }
 0xaaa   : > { %v2057_v15 = vmul.f32 %v1691_v59, %v746_v13 }
 0xaab   : > { %v766_v16 = vpack.c.bf16 %v2055_v14, %v2055_v14 }
 0xaac   : > { %v767_v17 = vpack.c.bf16 %v2057_v15, %v2057_v15 }
 0xaad   : > { %v770_v18 = vunpack.c.l.b16 %v766_v16 }
 0xaae   : > { %v771_v19 = vunpack.c.l.b16 %v767_v17 }
 0xaaf   : > { %v772_v20 = vrot.slane %v770_v18, 3 }
 0xab0   : > { %v773_v21 = vrot.slane %v771_v19, 2 }
 0xab2   : > { %v774_v24 = vsel %vm382_vm3, %v773_v21, %v772_v20  ;;  %v893_v21 = vld [vmem:[%s1910_s25] sm:$0x4] }
 0xab3   : > { %v775_v25 = vpack.c.b16 %v774_v24, %v774_v24  ;;  %v894_v24 = vld [vmem:[%s1910_s25 + $0x4] sm:$0x4] }
 0xab5   : > { %776 = vrot.lane.b32.xlu1 %v775_v25, %s1819_s9  ;;  %v895_v25 = vunpack.c.l.bf16 %v893_v21 }
 0xb27   : > { %v777_v26 = vpop.permute.xlu1 %776 }
 0xb28   : > { %1541 = vmatmul.mubr.msk.bf16.vlgmr.msra.gmra.mxu0 %vm254_vm2, %v777_v26  ;;  %v896_v26 = vunpack.c.l.bf16 %v894_v24 }
 0xb29   : > { %1553 = vmatpush3.bf16.msra.mxu0 %v1915_v3  ;;  %1556 = vmatprep.mubr.msk.bf16.mxu0 %vm1818_vm1, %v1817_v4 }
 0xb2a   : > { %1554 = vmatprep.subr.bf16.mxu0 %v1817_v4 }
 0xb2d   : > { %1555 = vmatpush3.bf16.msra.mxu0 %v1920_v5 }
 0xbe8   : > { %v815_v31 = vpop.f32.mrf.mxu0 }
 0xbe9   : > { %v822_v33 = vrot.slane %v815_v31, 4  ;;  %v823_v35 = vrot.slane %v815_v31, 5 }
 0xbea   : > { %v1542_v36 = vpop.f32.mrf.mxu0 }
 0xbeb   : > { %v826_v37 = vadd.f32 %v822_v33, %v764_v29  ;;  %v827_v38 = vadd.f32 %v823_v35, %v765_v30 }
 0xbec   : > { %v818_v39 = vpop.f32.mrf.mxu0 }
 0xbed   : > { %1696 = vtanh.f32 %v826_v37  ;;  %v1463_v43 = vmul.f32 -1.442695, %v826_v37  ;;  %v1464_v44 = vmul.f32 -1.442695, %v827_v38 }
 0xbee   : > { %1698 = vtanh.f32 %v827_v38  ;;  %v1543_v40 = vpop.f32.mrf.mxu0 }
 0xbef   : > { %1700 = vpow2.f32 %v1463_v43 }
 0xbf0   : > { %1702 = vpow2.f32 %v1464_v44 }
 0xbfa   : > { %v1697_v41 = vpop.eup %1696 }
 0xbfb   : > { %v1699_v42 = vpop.eup %1698  ;;  %852 = vrot.lane.b32.xlu0 %v1697_v41, %s1820_s27 }
 0xbfc   : > { %854 = vrot.lane.b32.xlu1 %v1699_v42, %s1820_s27  ;;  %v1701_v45 = vpop.eup %1700 }
 0xbfd   : > { %v1703_v47 = vpop.eup %1702  ;;  %v834_v48 = vadd.f32 1.0, %v1701_v45 }
 0xbfe   : > { %v835_v49 = vadd.f32 1.0, %v1703_v47 }
 0xbff   : > { %1704 = vrcp.f32 %v834_v48 }
 0xc00   : > { %1706 = vrcp.f32 %v835_v49 }
 0xc0c   : > { %v1705_v51 = vpop.eup %1704 }
 0xc0d   : > { %v1707_v53 = vpop.eup %1706  ;;  %v848_v59 = vmul.f32 %v1705_v51, %v844_v57 }
 0xc0e   : > { %v849_v60 = vmul.f32 %v1707_v53, %v845_v58 }
 0xc6d   : > { %v853_v52 = vpop.permute.xlu0 %852 }
 0xc6e   : > { %v855_v54 = vpop.permute.xlu1 %854  ;;  %v858_v55 = vmul.f32 %v1705_v51, %v853_v52 }
 0xc6f   : > { %v859_v56 = vmul.f32 %v1707_v53, %v855_v54 }
 0xc70   : > { %862 = vrot.lane.b32.xlu0 %v858_v55, %s1819_s9 }
 0xc71   : > { %864 = vrot.lane.b32.xlu1 %v859_v56, %s1819_s9 }
 0xce2   : > { %v863_v61 = vpop.permute.xlu0 %862 }
 0xce3   : > { %v865_v62 = vpop.permute.xlu1 %864  ;;  %v2079_v63 = vadd.f32 %v863_v61, %v848_v59 }
 0xce4   : > { %v2081_v0 = vadd.f32 %v865_v62, %v849_v60 }
 0xce5   : > { %1708 = vtanh.f32 %v2079_v63  ;;  %v975_v49 = vrot.slane %v2079_v63, 7 }
 0xce6   : > { %1710 = vtanh.f32 %v2081_v0 }
 0xcf2   : > { %v1709_v1 = vpop.eup %1708 }
 0xcf3   : > { %v1711_v2 = vpop.eup %1710  ;;  %874 = vrot.lane.b32.xlu0 %v1709_v1, %s1820_s27 }
 0xcf4   : > { %876 = vrot.lane.b32.xlu1 %v1711_v2, %s1820_s27 }
 0xd65   : > { %v875_v6 = vpop.permute.xlu0 %874 }
 0xd66   : > { %v877_v7 = vpop.permute.xlu1 %876  ;;  %v2087_v8 = vmul.f32 %v1705_v51, %v875_v6  ;;  %v976_v51 = vrot.slane %v2081_v0, 7 }
 0xd67   : > { %v2089_v9 = vmul.f32 %v1707_v53, %v877_v7 }
 0xd68   : > { %v897_v10 = vpack.c.bf16 %v2087_v8, %v2087_v8 }
 0xd69   : > { %v898_v11 = vpack.c.bf16 %v2089_v9, %v2089_v9 }
 0xd6a   : > { %v901_v12 = vunpack.c.l.b16 %v897_v10 }
 0xd6b   : > { %v902_v13 = vunpack.c.l.b16 %v898_v11 }
 0xd6c   : > { %v903_v16 = vrot.slane %v901_v12, 4 }
 0xd6d   : > { %v904_v17 = vrot.slane %v902_v13, 3 }
 0xd6f   : > { %v905_v18 = vsel %vm382_vm3, %v904_v17, %v903_v16  ;;  %v1024_v16 = vld [vmem:[%s1910_s25] sm:$0x8]  ;;  %v1025_v17 = vld [vmem:[%s1910_s25 + $0x4] sm:$0x8] }
 0xd70   : > { %v906_v19 = vpack.c.b16 %v905_v18, %v905_v18  ;;  %v1026_v18 = vunpack.c.l.bf16 %v1024_v16 }
 0xd72   : > { %907 = vrot.lane.b32.xlu0 %v906_v19, %s1819_s9  ;;  %v1027_v19 = vunpack.c.l.bf16 %v1025_v17 }
 0xde4   : > { %v908_v20 = vpop.permute.xlu0 %907 }
 0xde5   : > { %1549 = vmatmul.mubr.msk.bf16.vlgmr.msra.gmra.mxu1 %vm254_vm2, %v908_v20 }
 0xde6   : > { %1561 = vmatpush3.bf16.msra.mxu1 %v1915_v3  ;;  %1564 = vmatprep.mubr.msk.bf16.mxu1 %vm1818_vm1, %v1817_v4 }
 0xde7   : > { %1562 = vmatprep.subr.bf16.mxu1 %v1817_v4 }
 0xdea   : > { %1563 = vmatpush3.bf16.msra.mxu1 %v1920_v5 }
 0xea5   : > { %v946_v27 = vpop.f32.mrf.mxu1 }
 0xea6   : > { %v953_v28 = vrot.slane %v946_v27, 3  ;;  %v954_v29 = vrot.slane %v946_v27, 4 }
 0xea7   : > { %v1550_v30 = vpop.f32.mrf.mxu1 }
 0xea8   : > { %v957_v31 = vadd.f32 %v953_v28, %v895_v25  ;;  %v958_v33 = vadd.f32 %v954_v29, %v896_v26 }
 0xea9   : > { %v949_v35 = vpop.f32.mrf.mxu1 }
 0xeaa   : > { %1712 = vtanh.f32 %v957_v31  ;;  %v1466_v4 = vmul.f32 -1.442695, %v957_v31  ;;  %v1467_v5 = vmul.f32 -1.442695, %v958_v33 }
 0xeab   : > { %1714 = vtanh.f32 %v958_v33  ;;  %v1551_v3 = vpop.f32.mrf.mxu1 }
 0xeac   : > { %1716 = vpow2.f32 %v1466_v4 }
 0xead   : > { %1718 = vpow2.f32 %v1467_v5 }
 0xeb7   : > { %v1713_v36 = vpop.eup %1712 }
 0xeb8   : > { %v1715_v37 = vpop.eup %1714  ;;  %983 = vrot.lane.b32.xlu1 %v1713_v36, %s1820_s27 }
 0xeb9   : > { %985 = vrot.lane.b32.xlu0 %v1715_v37, %s1820_s27  ;;  %v1717_v38 = vpop.eup %1716 }
 0xeba   : > { %v1719_v39 = vpop.eup %1718  ;;  %v965_v40 = vadd.f32 1.0, %v1717_v38 }
 0xebb   : > { %v966_v41 = vadd.f32 1.0, %v1719_v39 }
 0xebc   : > { %1720 = vrcp.f32 %v965_v40 }
 0xebd   : > { %1722 = vrcp.f32 %v966_v41 }
 0xec9   : > { %v1721_v42 = vpop.eup %1720 }
 0xeca   : > { %v1723_v44 = vpop.eup %1722  ;;  %v979_v52 = vmul.f32 %v1721_v42, %v975_v49 }
 0xecb   : > { %v980_v53 = vmul.f32 %v1723_v44, %v976_v51 }
 0xf2a   : > { %v984_v43 = vpop.permute.xlu1 %983 }
 0xf2b   : > { %v986_v45 = vpop.permute.xlu0 %985  ;;  %v989_v47 = vmul.f32 %v1721_v42, %v984_v43 }
 0xf2c   : > { %v990_v48 = vmul.f32 %v1723_v44, %v986_v45 }
 0xf2d   : > { %993 = vrot.lane.b32.xlu1 %v989_v47, %s1819_s9 }
 0xf2e   : > { %995 = vrot.lane.b32.xlu0 %v990_v48, %s1819_s9 }
 0xf9f   : > { %v994_v54 = vpop.permute.xlu1 %993 }
 0xfa0   : > { %v996_v55 = vpop.permute.xlu0 %995  ;;  %v999_v56 = vadd.f32 %v994_v54, %v979_v52 }
 0xfa1   : > { %v1000_v57 = vadd.f32 %v996_v55, %v980_v53 }
 0xfa2   : > { %1724 = vtanh.f32 %v999_v56  ;;  %v1106_v43 = vrot.slane %v999_v56, 7 }
 0xfa3   : > { %1726 = vtanh.f32 %v1000_v57 }
 0xfaf   : > { %v1725_v58 = vpop.eup %1724 }
 0xfb0   : > { %v1727_v59 = vpop.eup %1726  ;;  %1005 = vrot.lane.b32.xlu1 %v1725_v58, %s1820_s27 }
 0xfb1   : > { %1007 = vrot.lane.b32.xlu0 %v1727_v59, %s1820_s27 }
0x1022   : > { %v1006_v60 = vpop.permute.xlu1 %1005 }
0x1023   : > { %v1008_v61 = vpop.permute.xlu0 %1007  ;;  %v2113_v62 = vmul.f32 %v1721_v42, %v1006_v60 }
0x1024   : > { %v2115_v63 = vmul.f32 %v1723_v44, %v1008_v61  ;;  %v1107_v44 = vrot.slane %v1000_v57, 7 }
0x1025   : > { %v1028_v0 = vpack.c.bf16 %v2113_v62, %v2113_v62 }
0x1026   : > { %v1029_v1 = vpack.c.bf16 %v2115_v63, %v2115_v63 }
0x1027   : > { %v1032_v2 = vunpack.c.l.b16 %v1028_v0 }
0x1028   : > { %v1033_v6 = vunpack.c.l.b16 %v1029_v1 }
0x1029   : > { %v1034_v7 = vrot.slane %v1032_v2, 5 }
0x102a   : > { %v1035_v10 = vrot.slane %v1033_v6, 4 }
0x102c   : > { %v1036_v11 = vsel %vm382_vm3, %v1035_v10, %v1034_v7 }
0x102d   : > { %v1037_v12 = vpack.c.b16 %v1036_v11, %v1036_v11  ;;  %v1155_v11 = vld [vmem:[%s1910_s25] sm:$0x8] }
0x102f   : > { %1038 = vrot.lane.b32.xlu1 %v1037_v12, %s1819_s9  ;;  %v1156_v12 = vld [vmem:[%s1910_s25 + $0x4] sm:$0x8] }
0x1030   : > { %v1158_v16 = vunpack.c.l.bf16 %v1156_v12 }
0x10a1   : > { %v1039_v13 = vpop.permute.xlu1 %1038 }
0x10a2   : > { %1557 = vmatmul.mubr.msk.bf16.vlgmr.msra.gmra.mxu0 %vm254_vm2, %v1039_v13  ;;  %v1157_v13 = vunpack.c.l.bf16 %v1155_v11 }
0x1162   : > { %v1077_v20 = vpop.f32.mrf.mxu0 }
0x1163   : > { %v1084_v21 = vrot.slane %v1077_v20, 2  ;;  %v1085_v24 = vrot.slane %v1077_v20, 3 }
0x1164   : > { %v1558_v25 = vpop.f32.mrf.mxu0 }
0x1165   : > { %v1088_v26 = vadd.f32 %v1084_v21, %v1026_v18  ;;  %v1089_v27 = vadd.f32 %v1085_v24, %v1027_v19 }
0x1166   : > { %v1080_v28 = vpop.f32.mrf.mxu0 }
0x1167   : > { %1728 = vtanh.f32 %v1088_v26  ;;  %v1469_v33 = vmul.f32 -1.442695, %v1088_v26  ;;  %v1470_v35 = vmul.f32 -1.442695, %v1089_v27 }
0x1168   : > { %1730 = vtanh.f32 %v1089_v27  ;;  %v1559_v29 = vpop.f32.mrf.mxu0 }
0x1169   : > { %1732 = vpow2.f32 %v1469_v33 }
0x116a   : > { %1734 = vpow2.f32 %v1470_v35 }
0x1174   : > { %v1729_v30 = vpop.eup %1728 }
0x1175   : > { %v1731_v31 = vpop.eup %1730  ;;  %1114 = vrot.lane.b32.xlu0 %v1729_v30, %s1820_s27 }
0x1176   : > { %1116 = vrot.lane.b32.xlu1 %v1731_v31, %s1820_s27  ;;  %v1733_v3 = vpop.eup %1732 }
0x1177   : > { %v1735_v36 = vpop.eup %1734  ;;  %v1096_v37 = vadd.f32 1.0, %v1733_v3 }
0x1178   : > { %v1097_v4 = vadd.f32 1.0, %v1735_v36 }
0x1179   : > { %1736 = vrcp.f32 %v1096_v37 }
0x117a   : > { %1738 = vrcp.f32 %v1097_v4 }
0x1186   : > { %v1737_v5 = vpop.eup %1736 }
0x1187   : > { %v1739_v39 = vpop.eup %1738  ;;  %v1110_v45 = vmul.f32 %v1737_v5, %v1106_v43 }
0x1188   : > { %v1111_v47 = vmul.f32 %v1739_v39, %v1107_v44 }
0x11e7   : > { %v1115_v38 = vpop.permute.xlu0 %1114 }
0x11e8   : > { %v1117_v40 = vpop.permute.xlu1 %1116  ;;  %v1120_v41 = vmul.f32 %v1737_v5, %v1115_v38 }
0x11e9   : > { %v1121_v42 = vmul.f32 %v1739_v39, %v1117_v40 }
0x11ea   : > { %1124 = vrot.lane.b32.xlu0 %v1120_v41, %s1819_s9 }
0x11eb   : > { %1126 = vrot.lane.b32.xlu1 %v1121_v42, %s1819_s9 }
0x125c   : > { %v1125_v48 = vpop.permute.xlu0 %1124 }
0x125d   : > { %v1127_v49 = vpop.permute.xlu1 %1126  ;;  %v1130_v51 = vadd.f32 %v1125_v48, %v1110_v45 }
0x125e   : > { %v1131_v52 = vadd.f32 %v1127_v49, %v1111_v47 }
0x125f   : > { %1740 = vtanh.f32 %v1130_v51  ;;  %v1237_v40 = vrot.slane %v1130_v51, 7 }
0x1260   : > { %1742 = vtanh.f32 %v1131_v52  ;;  %v1238_v41 = vrot.slane %v1131_v52, 7 }
0x126c   : > { %v1741_v53 = vpop.eup %1740 }
0x126d   : > { %v1743_v54 = vpop.eup %1742  ;;  %1136 = vrot.lane.b32.xlu0 %v1741_v53, %s1820_s27 }
0x126e   : > { %1138 = vrot.lane.b32.xlu1 %v1743_v54, %s1820_s27 }
0x12df   : > { %v1137_v55 = vpop.permute.xlu0 %1136 }
0x12e0   : > { %v1139_v58 = vpop.permute.xlu1 %1138  ;;  %v2132_v56 = vmul.f32 %v1737_v5, %v1137_v55 }
0x12e1   : > { %v2134_v57 = vmul.f32 %v1739_v39, %v1139_v58 }
0x12e2   : > { %v1159_v59 = vpack.c.bf16 %v2132_v56, %v2132_v56 }
0x12e3   : > { %v1160_v60 = vpack.c.bf16 %v2134_v57, %v2134_v57 }
0x12e4   : > { %v1163_v61 = vunpack.c.l.b16 %v1159_v59 }
0x12e5   : > { %v1164_v0 = vunpack.c.l.b16 %v1160_v60 }
0x12e6   : > { %v1165_v1 = vrot.slane %v1163_v61, 6 }
0x12e7   : > { %v1166_v2 = vrot.slane %v1164_v0, 5 }
0x12e9   : > { %v1167_v6 = vsel %vm382_vm3, %v1166_v2, %v1165_v1 }
0x12ea   : > { %v1168_v7 = vpack.c.b16 %v1167_v6, %v1167_v6 }
0x12ec   : > { %1169 = vrot.lane.b32.xlu0 %v1168_v7, %s1819_s9 }
0x135e   : > { %v1170_v10 = vpop.permute.xlu0 %1169 }
0x135f   : > { %1565 = vmatmul.mubr.msk.bf16.vlgmr.msra.gmra.mxu1 %vm254_vm2, %v1170_v10 }
0x141f   : > { %v1208_v17 = vpop.f32.mrf.mxu1 }
0x1420   : > { %v1215_v18 = vrot.slane %v1208_v17, 1  ;;  %v1216_v19 = vrot.slane %v1208_v17, 2 }
0x1421   : > { %v1566_v20 = vpop.f32.mrf.mxu1 }
0x1422   : > { %v1219_v21 = vadd.f32 %v1215_v18, %v1157_v13  ;;  %v1220_v24 = vadd.f32 %v1216_v19, %v1158_v16 }
0x1423   : > { %v1211_v25 = vpop.f32.mrf.mxu1 }
0x1424   : > { %1744 = vtanh.f32 %v1219_v21  ;;  %v1472_v29 = vmul.f32 -1.442695, %v1219_v21  ;;  %v1473_v30 = vmul.f32 -1.442695, %v1220_v24 }
0x1425   : > { %1746 = vtanh.f32 %v1220_v24  ;;  %v1567_v26 = vpop.f32.mrf.mxu1 }
0x1426   : > { %1748 = vpow2.f32 %v1472_v29 }
0x1427   : > { %1750 = vpow2.f32 %v1473_v30 }
0x1431   : > { %v1745_v27 = vpop.eup %1744 }
0x1432   : > { %v1747_v28 = vpop.eup %1746  ;;  %1245 = vrot.lane.b32.xlu0 %v1745_v27, %s1820_s27 }
0x1433   : > { %1247 = vrot.lane.b32.xlu1 %v1747_v28, %s1820_s27  ;;  %v1749_v31 = vpop.eup %1748 }
0x1434   : > { %v1751_v33 = vpop.eup %1750  ;;  %v1227_v35 = vadd.f32 1.0, %v1749_v31 }
0x1435   : > { %v1228_v3 = vadd.f32 1.0, %v1751_v33 }
0x1436   : > { %1752 = vrcp.f32 %v1227_v35 }
0x1437   : > { %1754 = vrcp.f32 %v1228_v3 }
0x1443   : > { %v1753_v36 = vpop.eup %1752 }
0x1444   : > { %v1755_v4 = vpop.eup %1754  ;;  %v1241_v42 = vmul.f32 %v1753_v36, %v1237_v40 }
0x1445   : > { %v1242_v43 = vmul.f32 %v1755_v4, %v1238_v41 }
0x14a4   : > { %v1246_v37 = vpop.permute.xlu0 %1245 }
0x14a5   : > { %v1248_v5 = vpop.permute.xlu1 %1247  ;;  %v1251_v38 = vmul.f32 %v1753_v36, %v1246_v37 }
0x14a6   : > { %v1252_v39 = vmul.f32 %v1755_v4, %v1248_v5 }
0x14a7   : > { %1255 = vrot.lane.b32.xlu0 %v1251_v38, %s1819_s9 }
0x14a8   : > { %1257 = vrot.lane.b32.xlu1 %v1252_v39, %s1819_s9 }
0x1519   : > { %v1256_v44 = vpop.permute.xlu0 %1255 }
0x151a   : > { %v1258_v45 = vpop.permute.xlu1 %1257  ;;  %v1261_v47 = vadd.f32 %v1256_v44, %v1241_v42 }
0x151b   : > { %v1262_v48 = vadd.f32 %v1258_v45, %v1242_v43 }
0x151c   : > { %1756 = vtanh.f32 %v1261_v47 }
0x151d   : > { %1758 = vtanh.f32 %v1262_v48 }
0x1529   : > { %v1757_v49 = vpop.eup %1756 }
0x152a   : > { %v1759_v53 = vpop.eup %1758  ;;  %1267 = vrot.lane.b32.xlu0 %v1757_v49, %s1820_s27 }
0x152b   : > { %1269 = vrot.lane.b32.xlu1 %v1759_v53, %s1820_s27 }
0x152e   : > { %364 = vrot.lane.b32.xlu0 %v1956_v46, %s1819_s9 }
0x152f   : > { %362 = vrot.lane.b32.xlu1 %v1960_v50, %s1819_s9 }
0x1532   : > { %494 = vrot.lane.b32.xlu0 %v1989_v32, %s1819_s9 }
0x1533   : > { %492 = vrot.lane.b32.xlu1 %v1991_v34, %s1819_s9 }
0x1536   : > { %624 = vrot.lane.b32.xlu0 %v2024_v23, %s1819_s9 }
0x1537   : > { %622 = vrot.lane.b32.xlu1 %v2022_v22, %s1819_s9 }
0x153a   : > { %755 = vrot.lane.b32.xlu0 %v2057_v15, %s1819_s9 }
0x153b   : > { %753 = vrot.lane.b32.xlu1 %v2055_v14, %s1819_s9 }
0x153e   : > { %886 = vrot.lane.b32.xlu0 %v2089_v9, %s1819_s9 }
0x153f   : > { %884 = vrot.lane.b32.xlu1 %v2087_v8, %s1819_s9  ;;  %v1294_v8 = vrot.slane %v1262_v48, 7 }
0x1542   : > { %1017 = vrot.lane.b32.xlu0 %v2115_v63, %s1819_s9 }
0x1543   : > { %1015 = vrot.lane.b32.xlu1 %v2113_v62, %s1819_s9 }
0x1546   : > { %1148 = vrot.lane.b32.xlu0 %v2134_v57, %s1819_s9 }
0x1547   : > { %1146 = vrot.lane.b32.xlu1 %v2132_v56, %s1819_s9 }
0x159c   : > { %v1268_v46 = vpop.permute.xlu0 %1267 }
0x159d   : > { %v1270_v50 = vpop.permute.xlu1 %1269  ;;  %v1273_v32 = vmul.f32 %v1753_v36, %v1268_v46 }
0x159e   : > { %v1274_v34 = vmul.f32 %v1755_v4, %v1270_v50 }
0x159f   : > { %1277 = vrot.lane.b32.xlu1 %v1273_v32, %s1819_s9 }
0x15a0   : > { %1279 = vrot.lane.b32.xlu0 %v1274_v34, %s1819_s9  ;;  %v365_v22 = vpop.permute.xlu0 %364  ;;  %v1286_v23 = vrot.slane %v1274_v34, 7 }
0x15a1   : > { %v363_v14 = vpop.permute.xlu1 %362  ;;  %370 = vst.msk [vmem:[%s1912_s26 + $0x8] sm:$0x1] %vm368_vm4, %v365_v22 }
0x15a2   : > { %369 = vst.msk [vmem:[%s1912_s26] sm:$0x1] %vm368_vm4, %v363_v14 }
0x15a3   : > { %1287 = vrot.lane.b32.xlu1 %v1286_v23, %s1819_s9 }
0x15a4   : > { %1295 = vrot.lane.b32.xlu0 %v1261_v47, %s1821_s28  ;;  %v495_v15 = vpop.permute.xlu0 %494 }
0x15a5   : > { %v493_v9 = vpop.permute.xlu1 %492  ;;  %500 = vst.msk [vmem:[%s1912_s26 + $0x8] sm:$0x2] %vm498_vm5, %v495_v15 }
0x15a6   : > { %499 = vst.msk [vmem:[%s1912_s26] sm:$0x2] %vm498_vm5, %v493_v9 }
0x15a7   : > { %1297 = vrot.lane.b32.xlu1 %v1294_v8, %s1821_s28 }
0x15a8   : > { %v625_v62 = vpop.permute.xlu0 %624 }
0x15a9   : > { %v623_v63 = vpop.permute.xlu1 %622  ;;  %630 = vst.msk [vmem:[%s1912_s26 + $0x8] sm:$0x4] %vm628_vm6, %v625_v62 }
0x15aa   : > { %629 = vst.msk [vmem:[%s1912_s26] sm:$0x4] %vm628_vm6, %v623_v63 }
0x15ac   : > { %v756_v51 = vpop.permute.xlu0 %755 }
0x15ad   : > { %v754_v52 = vpop.permute.xlu1 %753  ;;  %761 = vst.msk [vmem:[%s1912_s26 + $0x8] sm:$0x8] %vm759_vm7, %v756_v51 }
0x15ae   : > { %760 = vst.msk [vmem:[%s1912_s26] sm:$0x8] %vm759_vm7, %v754_v52 }
0x15b0   : > { %v887_v54 = vpop.permute.xlu0 %886 }
0x15b1   : > { %v885_v55 = vpop.permute.xlu1 %884  ;;  %892 = vst.msk [vmem:[%s1912_s26 + $0x8] sm:$0x10] %vm890_vm8, %v887_v54 }
0x15b2   : > { %891 = vst.msk [vmem:[%s1912_s26] sm:$0x10] %vm890_vm8, %v885_v55 }
0x15b4   : > { %v1018_v58 = vpop.permute.xlu0 %1017 }
0x15b5   : > { %v1016_v56 = vpop.permute.xlu1 %1015  ;;  %1023 = vst.msk [vmem:[%s1912_s26 + $0x8] sm:$0x20] %vm1021_vm9, %v1018_v58 }
0x15b6   : > { %1022 = vst.msk [vmem:[%s1912_s26] sm:$0x20] %vm1021_vm9, %v1016_v56 }
0x15b8   : > { %v1149_v57 = vpop.permute.xlu0 %1148 }
0x15b9   : > { %v1147_v59 = vpop.permute.xlu1 %1146  ;;  %1154 = vst.msk [vmem:[%s1912_s26 + $0x8] sm:$0x40] %vm1152_vm10, %v1149_v57 }
0x15ba   : > { %1153 = vst.msk [vmem:[%s1912_s26] sm:$0x40] %vm1152_vm10, %v1147_v59 }
0x1611   : > { %v1278_v60 = vpop.permute.xlu1 %1277 }
0x1612   : > { %1284 = vst.msk [vmem:[%s1912_s26] sm:$0x80] %vm1283_vm11, %v1278_v60  ;;  %1290 = vst.msk [vmem:[#allocation2 - $0x7] sm:$0x80] %vm1283_vm11, %v1278_v60  ;;  %v1280_v61 = vpop.permute.xlu0 %1279 }
0x1613   : > { %1285 = vst.msk [vmem:[%s1912_s26 + $0x8] sm:$0x80] %vm1283_vm11, %v1280_v61 }
0x1615   : > { %v1288_v0 = vpop.permute.xlu1 %1287 }
0x1616   : > { %1291 = vst.msk [vmem:[#allocation2 + $0x1] sm:$0x1] %vm368_vm4, %v1288_v0  ;;  %v1296_v1 = vpop.permute.xlu0 %1295  ;;  %1309 = sbr.rel (!%p1885_p6) target bundleno = 5660 (0x161c), region = 77 }
0x1617   : > { %1301 = vst.msk [vmem:[#allocation3 - $0x7] sm:$0x80] %vm1283_vm11, %v1296_v1 }
0x1619   : > { %v1298_v2 = vpop.permute.xlu1 %1297  ;;  %v1344_v6 = vld [vmem:[%s1912_s26] sm:$0xff] (%p1885_p6) }
0x161a   : > { %1302 = vst.msk [vmem:[#allocation3 + $0x1] sm:$0x1] %vm368_vm4, %v1298_v2  ;;  %v1346_v7 = vld [vmem:[%s1912_s26 + $0x8] sm:$0xff] (%p1885_p6)  ;;  %1345 = vst [vmem:[%s1313_s6] sm:$0xff] (%p1885_p6), %v1344_v6 }
0x161b   : > { %1347 = vst [vmem:[%s1313_s6 + $0x20] sm:$0xff] %v1346_v7 }
0x161c PF: > { %s12_s15 = sadd.s32 1, %s1814_s15   ;;  %s2236_s9 = smov %s1794_s10 }
0x161d   : > { %p9_p0 = scmp.ge.s32.totalorder %s12_s15, 10   ;;  %s2237_s10 = smov %s1893_s24 }
0x161e   : > { %s2238_s11 = smov %s1806_s13  ;;  %s2239_s12 = smov %s1810_s14 }
0x161f   : > { %s2240_s13 = smov %s2243_s16  ;;  %s2241_s14 = smov %s2247_s17 }
0x1620   :  { %11 = sbr.rel (!%p9_p0) target bundleno = 4 (0x4), region = 149 }

</bundles_post_ra>
